<compile_context>
chip_gen: v5e
topology: v5e:2x2
jax: 0.10.0
libtpu: 0.0.40
codegen_flags: <defaults>
</compile_context>

<pallas_src>
import functools

import jax
import jax.numpy as jnp
from jax.experimental import pallas as pl
from jax.experimental.pallas import tpu as pltpu

_NEG_BIG = -1.0e30


def _sim_tile(f0_ref, f1_ref, inv_scale):
    """sim tile = (feat0 @ feat1^T) * inv_scale, f32 accumulation on the MXU.

    f32 features: fold the scale into the LHS ([tl,C] mul, cheaper than [tl,S]).
    bf16 features: scale the f32 product instead, so the MXU operand is not
    re-quantized (perf-review correctness note).
    The NT contraction (last dim of both operands) is the same layout
    flash-attention uses for q @ k^T — no in-kernel transpose of the resident
    [S, C] block is required.
    """
    f0 = f0_ref[0]
    f1 = f1_ref[0]
    dn = (((1,), (1,)), ((), ()))
    if f0.dtype == jnp.float32:
        f0 = f0 * jnp.float32(inv_scale)
        return jax.lax.dot_general(f0, f1, dimension_numbers=dn,
                                   preferred_element_type=jnp.float32)
    sim = jax.lax.dot_general(f0, f1, dimension_numbers=dn,
                              preferred_element_type=jnp.float32)
    return sim * jnp.float32(inv_scale)


def _stats_kernel(f0_ref, f1_ref, acol_ref, harg_ref, brow_ref,
                  m_sc, z_sc, hmax_sc, *, inv_scale, block_l, l_total):
    """Pass A (grid = (batch, L-tile), L-tile is a reduction axis).

    Per L-tile it emits b_row = logsumexp_S(sim) (the row log-normalizer), and
    accumulates (i) the per-column logsumexp over L with a single scalar tile
    shift (one full-tile exp reused from the row pass) and (ii) the per-column
    argmax of the column-ordering surrogate h = 2*sim - b_row.
    """
    i = pl.program_id(1)
    nl = pl.num_programs(1)
    s_dim = acol_ref.shape[2]

    sim = _sim_tile(f0_ref, f1_ref, inv_scale)                  # [tl, S] f32

    if l_total % block_l != 0:
        # Ragged tail: rows >= L are pipeline padding -> push to -BIG so they
        # contribute exp(-BIG - c) == 0 to every accumulator below.
        rows = i * block_l + jax.lax.broadcasted_iota(jnp.int32, (block_l, 1), 0)
        sim = jnp.where(rows < l_total, sim, _NEG_BIG)

    # Row (over S) softmax log-normalizer — exact, the full S axis is in the tile.
    m_s = jnp.max(sim, axis=1, keepdims=True)                   # [tl, 1]
    e = jnp.exp(sim - m_s)                                      # [tl, S]  (only full-tile exp)
    z_s = jnp.sum(e, axis=1, keepdims=True)                     # [tl, 1]
    b_row = m_s + jnp.log(z_s)                                  # [tl, 1]
    brow_ref[0] = b_row

    # Column-ordering surrogate: log conf = 2*sim - a_col[s] - b_row[l], so the
    # ordering of conf along L (fixed s) is the ordering of h = 2*sim - b_row.
    h = 2.0 * sim - b_row                                       # [tl, S]
    t_hmax = jnp.max(h, axis=0, keepdims=True)                  # [1, S]
    rows_i = i * block_l + jax.lax.broadcasted_iota(jnp.int32, h.shape, 0)
    t_harg = jnp.min(jnp.where(h == t_hmax, rows_i, jnp.int32(2 ** 30)),
                     axis=0, keepdims=True)                     # [1, S] global row idx

    # Per-tile column sums with a single scalar shift c (reuses e -> no 2nd
    # full-tile exp; only a [tl,1] exp + broadcast mul).  Assumes the per-batch
    # sim dynamic range stays within f32 exp range (~88), true for LoFTR sims;
    # a floor on z before the final log bounds the failure mode anyway.
    c = jnp.max(m_s, axis=0, keepdims=True)                     # (1, 1)
    t_z = jnp.sum(e * jnp.exp(m_s - c), axis=0, keepdims=True)  # [1, S] = sum_l exp(sim - c)

    @pl.when(i == 0)
    def _():
        m_sc[...] = jnp.full(m_sc.shape, _NEG_BIG, jnp.float32)
        z_sc[...] = jnp.zeros(z_sc.shape, jnp.float32)
        hmax_sc[...] = jnp.full(hmax_sc.shape, _NEG_BIG, jnp.float32)
        harg_ref[0] = jnp.zeros((1, s_dim), jnp.int32)
        acol_ref[0] = jnp.zeros((1, s_dim), jnp.float32)

    # Online (rescaled) column logsumexp accumulation.
    m_old = m_sc[...]
    m_new = jnp.maximum(m_old, c)
    z_sc[...] = z_sc[...] * jnp.exp(m_old - m_new) + t_z * jnp.exp(c - m_new)
    m_sc[...] = m_new

    # Running column argmax of h (first index among exact ties; the reference
    # marks all ties — irrelevant for continuous-valued features).
    better = t_hmax > hmax_sc[...]
    hmax_sc[...] = jnp.where(better, t_hmax, hmax_sc[...])
    harg_ref[0] = jnp.where(better, t_harg, harg_ref[0])

    @pl.when(i == nl - 1)
    def _():
        z = jnp.maximum(z_sc[...], jnp.float32(jnp.finfo(jnp.float32).tiny))
        acol_ref[0] = m_sc[...] + jnp.log(z)                    # column log-normalizer


def _conf_mask_kernel(f0_ref, f1_ref, acol_ref, harg_ref, brow_ref,
                      conf_ref, mask_ref, sim_ref=None, *, inv_scale, block_l):
    """Pass B (fully parallel grid): conf + mutual-nearest mask (+ optional sim)."""
    i = pl.program_id(1)

    sim = _sim_tile(f0_ref, f1_ref, inv_scale)                  # [tl, S] f32
    a_col = acol_ref[0]                                         # [1, S]
    b_row = brow_ref[0]                                         # [tl, 1]

    # conf = softmax_L(sim) * softmax_S(sim) = exp(2*sim - a_col - b_row):
    # exact log-space formulation, one exp, no reciprocals.
    log_conf = (sim - a_col) + (sim - b_row)                    # <= 0
    conf = jnp.exp(log_conf)                                    # f32
    conf_ref[0] = conf.astype(conf_ref.dtype)

    # Mutual nearest neighbour:
    #  - rows (over S): conf == row max of conf (full S in the tile, self-consistent);
    #  - cols (over L): global row index == per-column argmax from pass A.
    row_ok = conf == jnp.max(conf, axis=1, keepdims=True)
    gidx = i * block_l + jax.lax.broadcasted_iota(jnp.int32, (sim.shape[0], 1), 0)
    col_ok = gidx == harg_ref[0]                                # [tl,1] vs [1,S]
    mask_ref[0] = jnp.logical_and(row_ok, col_ok).astype(jnp.int8)

    if sim_ref is not None:
        sim_ref[0] = sim.astype(sim_ref.dtype)


def coarse_matching_dual_softmax(feat_c0, feat_c1, temperature, *,
                                 block_l_stats=512, block_l_out=256,
                                 out_dtype=jnp.bfloat16, return_sim=False,
                                 vmem_limit_bytes=None):
    """Dual-softmax coarse matching.

    Returns (conf_matrix[N,L,S] out_dtype, mutual_mask[N,L,S] int8) and optionally
    sim_matrix[N,L,S] out_dtype when return_sim=True.

    Tuning notes (perf review):
      * block_l_out: <=256 on v7x (64 MiB VMEM), 512 on v6e/v5e with a raised
        vmem_limit_bytes; block_l_stats can be larger (pass A has no big output tile).
      * out_dtype=bf16 (default) cuts pass-B HBM writeback from 5 to 3 B/elem.
      * L need not be divisible by the tiles; the tail is masked in-kernel.
      * Pass bf16 features for a bf16-native MXU path (f32 accumulation is kept).
    """
    N, L, C = feat_c0.shape
    Nb, S, Cb = feat_c1.shape
    assert N == Nb and C == Cb
    block_l_stats = min(block_l_stats, L)
    block_l_out = min(block_l_out, L)
    assert block_l_stats == L or block_l_stats % 8 == 0
    assert block_l_out == L or block_l_out % 32 == 0   # int8 mask sublane tiling
    num_ls = pl.cdiv(L, block_l_stats)
    num_lo = pl.cdiv(L, block_l_out)
    inv_scale = 1.0 / (float(C) * float(temperature))

    def _cparams(sem):
        kw = dict(dimension_semantics=sem)
        if vmem_limit_bytes is not None:
            kw["vmem_limit_bytes"] = vmem_limit_bytes
        return pltpu.CompilerParams(**kw)

    stat_spec = pl.BlockSpec((1, 1, S), lambda b, i: (b, 0, 0))
    # NOTE(v7x): if VMEM is tight, the resident feat_c1 block below can use
    # pipeline_mode=pl.Buffered(1) since its index_map is constant per batch.
    f1_spec = pl.BlockSpec((1, S, C), lambda b, i: (b, 0, 0))

    # --- Pass A: column log-normalizer + column argmax (of h) + row log-normalizer.
    acol, harg, brow = pl.pallas_call(
        functools.partial(_stats_kernel, inv_scale=inv_scale,
                          block_l=block_l_stats, l_total=L),
        out_shape=(
            jax.ShapeDtypeStruct((N, 1, S), jnp.float32),   # a_col
            jax.ShapeDtypeStruct((N, 1, S), jnp.int32),     # per-column argmax over L
            jax.ShapeDtypeStruct((N, L, 1), jnp.float32),   # b_row
        ),
        grid_spec=pltpu.PrefetchScalarGridSpec(
            num_scalar_prefetch=0,
            grid=(N, num_ls),
            in_specs=[
                pl.BlockSpec((1, block_l_stats, C), lambda b, i: (b, i, 0)),
                f1_spec,
            ],
            out_specs=(stat_spec, stat_spec,
                       pl.BlockSpec((1, block_l_stats, 1), lambda b, i: (b, i, 0))),
            scratch_shapes=[pltpu.VMEM((1, S), jnp.float32)] * 3,   # m, z, hmax
        ),
        compiler_params=_cparams(("parallel", "arbitrary")),
    )(feat_c0, feat_c1)

    # --- Pass B: conf (out_dtype) + int8 mutual-max mask (+ optional sim). ---
    out_shapes = [
        jax.ShapeDtypeStruct((N, L, S), out_dtype),
        jax.ShapeDtypeStruct((N, L, S), jnp.int8),
    ]
    tile_spec = pl.BlockSpec((1, block_l_out, S), lambda b, i: (b, i, 0))
    out_specs = [tile_spec, tile_spec]
    if return_sim:
        out_shapes.append(jax.ShapeDtypeStruct((N, L, S), out_dtype))
        out_specs.append(tile_spec)

    outs = pl.pallas_call(
        functools.partial(_conf_mask_kernel, inv_scale=inv_scale,
                          block_l=block_l_out),
        out_shape=tuple(out_shapes),
        grid_spec=pltpu.PrefetchScalarGridSpec(
            num_scalar_prefetch=0,
            grid=(N, num_lo),
            in_specs=[
                pl.BlockSpec((1, block_l_out, C), lambda b, i: (b, i, 0)),
                f1_spec,
                stat_spec, stat_spec,
                pl.BlockSpec((1, block_l_out, 1), lambda b, i: (b, i, 0)),
            ],
            out_specs=tuple(out_specs),
        ),
        compiler_params=_cparams(("parallel", "parallel")),
    )(feat_c0, feat_c1, acol, harg, brow)

    if return_sim:
        conf, mask, sim = outs
        return conf, mask, sim
    conf, mask = outs
    return conf, mask


def _reference(feat_c0, feat_c1, temperature):
    C = feat_c0.shape[-1]
    f0 = feat_c0 / jnp.sqrt(jnp.float32(C))
    f1 = feat_c1 / jnp.sqrt(jnp.float32(C))
    sim = jnp.einsum('nlc,nsc->nls', f0, f1,
                     precision=jax.lax.Precision.HIGHEST) / temperature
    conf = jax.nn.softmax(sim, axis=1) * jax.nn.softmax(sim, axis=2)
    mask = (conf == jnp.max(conf, axis=1, keepdims=True)) & \
           (conf == jnp.max(conf, axis=2, keepdims=True))
    return sim, conf, mask.astype(jnp.int8)


if __name__ == "__main__":
    # Synthetic config (mirrors CoarseMatching.__init__ for dual_softmax).
    config = {
        'THR': 0.2,
        'BORDER_RM': 2,
        'TRAIN_COARSE_PERCENT': 0.4,
        'TRAIN_PAD_NUM_GT_MIN': 200,
        'MATCH_TYPE': 'dual_softmax',
        'DSMAX_TEMPERATURE': 0.1,
    }
    temp = config['DSMAX_TEMPERATURE']

    key = jax.random.PRNGKey(0)
    k0, k1, k2, k3 = jax.random.split(key, 4)

    # --- Test 1: production path (bf16 conf + int8 mask), decoupled tile sizes. ---
    N, L, S, C = 2, 256, 256, 32
    feat_c0 = jax.random.normal(k0, (N, L, C), dtype=jnp.float32)
    feat_c1 = jax.random.normal(k1, (N, S, C), dtype=jnp.float32)

    conf, mask = coarse_matching_dual_softmax(
        feat_c0, feat_c1, temp, block_l_stats=64, block_l_out=128)
    jax.block_until_ready((conf, mask))

    sim_r, conf_r, mask_r = _reference(feat_c0, feat_c1, temp)
    assert conf.dtype == jnp.bfloat16
    assert jnp.allclose(conf.astype(jnp.float32), conf_r, atol=2e-3, rtol=1e-2), \
        "conf (bf16) mismatch"
    assert jnp.array_equal(mask, mask_r), "mask mismatch"

    # --- Test 2: f32 outputs + sim_matrix (needed if downstream wants `msim`). ---
    conf2, mask2, sim2 = coarse_matching_dual_softmax(
        feat_c0, feat_c1, temp, block_l_stats=128, block_l_out=128,
        out_dtype=jnp.float32, return_sim=True)
    jax.block_until_ready((conf2, mask2, sim2))
    assert jnp.allclose(conf2, conf_r, atol=1e-4, rtol=2e-3), "conf (f32) mismatch"
    assert jnp.allclose(sim2, sim_r, atol=1e-3, rtol=1e-3), "sim mismatch"
    assert jnp.array_equal(mask2, mask_r), "mask mismatch (return_sim path)"

    # --- Test 3: ragged L (not divisible by either tile) -> in-kernel tail mask. ---
    L3, S3 = 200, 128
    f0_t = jax.random.normal(k2, (N, L3, C), dtype=jnp.float32)
    f1_t = jax.random.normal(k3, (N, S3, C), dtype=jnp.float32)
    conf3, mask3 = coarse_matching_dual_softmax(
        f0_t, f1_t, temp, block_l_stats=64, block_l_out=128)
    jax.block_until_ready((conf3, mask3))
    _, conf3_r, mask3_r = _reference(f0_t, f1_t, temp)
    assert jnp.allclose(conf3.astype(jnp.float32), conf3_r, atol=2e-3, rtol=1e-2), \
        "conf (ragged) mismatch"
    assert jnp.array_equal(mask3, mask3_r), "mask mismatch (ragged)"

    # TODO(synk): dynamic torch.where(mask) -> (b_ids, i_ids, j_ids) gather, mkpts
    # grid-coordinate math and physical landmark conversion need data-dependent
    # output sizes; left to host-side JAX/NumPy downstream.

    print("KERNEL_OK")
</pallas_src>

<mosaic_0001>
module attributes {stable_mosaic.version = 11 : i64} {
  func.func @_stats_kernel(%arg0: i32, %arg1: i32, %arg2: memref<1x64x32xf32, #tpu.memory_space<vmem>>, %arg3: memref<1x256x32xf32, #tpu.memory_space<vmem>>, %arg4: memref<1x1x256xf32, #tpu.memory_space<vmem>>, %arg5: memref<1x1x256xi32, #tpu.memory_space<vmem>>, %arg6: memref<1x64x1xf32, #tpu.memory_space<vmem>>, %arg7: memref<1x256xf32, #tpu.memory_space<vmem>>, %arg8: memref<1x256xf32, #tpu.memory_space<vmem>>, %arg9: memref<1x256xf32, #tpu.memory_space<vmem>>) attributes {dimension_semantics = [#tpu.dimension_semantics<parallel>, #tpu.dimension_semantics<arbitrary>], iteration_bounds = array<i64: 2, 4>, scalar_prefetch = 0 : i64, scratch_operands = 3 : i64, tpu.core_type = #tpu.core_type<tc>, window_params = [{transform_indices = @transform_0, window_bounds = array<i64: 1, 64, 32>}, {transform_indices = @transform_1, window_bounds = array<i64: 1, 256, 32>}, {transform_indices = @transform_2, window_bounds = array<i64: 1, 1, 256>}, {transform_indices = @transform_3, window_bounds = array<i64: 1, 1, 256>}, {transform_indices = @transform_4, window_bounds = array<i64: 1, 64, 1>}]} {
    %c0 = arith.constant 0 : index
    %c0_0 = arith.constant 0 : index
    %c0_1 = arith.constant 0 : index
    %0 = vector.load %arg2[%c0, %c0_0, %c0_1] : memref<1x64x32xf32, #tpu.memory_space<vmem>>, vector<1x64x32xf32>
    %1 = vector.shape_cast %0 : vector<1x64x32xf32> to vector<64x32xf32>
    %c0_2 = arith.constant 0 : index
    %c0_3 = arith.constant 0 : index
    %c0_4 = arith.constant 0 : index
    %2 = vector.load %arg3[%c0_2, %c0_3, %c0_4] : memref<1x256x32xf32, #tpu.memory_space<vmem>>, vector<1x256x32xf32>
    %3 = vector.shape_cast %2 : vector<1x256x32xf32> to vector<256x32xf32>
    %cst = arith.constant 3.125000e-01 : f32
    %4 = vector.broadcast %cst : f32 to vector<64x32xf32>
    %5 = arith.mulf %1, %4 : vector<64x32xf32>
    %cst_5 = arith.constant dense<0.000000e+00> : vector<64x256xf32>
    %6 = tpu.matmul %5, %3, %cst_5 {dimension_numbers = #tpu.dot_dimension_numbers<[1], [1], [0], [0], [0, 0, 1, 0], [], []>} : vector<64x32xf32>, vector<256x32xf32>, vector<64x256xf32> -> vector<64x256xf32>
    %cst_6 = arith.constant dense<0xFF800000> : vector<64xf32>
    %7 = vector.multi_reduction <maximumf>, %6, %cst_6 [1] : vector<64x256xf32> to vector<64xf32>
    %8 = vector.shape_cast %7 : vector<64xf32> to vector<64x1xf32>
    %9 = vector.broadcast %8 : vector<64x1xf32> to vector<64x256xf32>
    %10 = arith.subf %6, %9 : vector<64x256xf32>
    %11 = math.exp %10 : vector<64x256xf32>
    %cst_7 = arith.constant dense<0.000000e+00> : vector<64xf32>
    %12 = vector.multi_reduction <add>, %11, %cst_7 [1] : vector<64x256xf32> to vector<64xf32>
    %13 = vector.shape_cast %12 : vector<64xf32> to vector<64x1xf32>
    %14 = math.log %13 : vector<64x1xf32>
    %15 = arith.addf %8, %14 : vector<64x1xf32>
    %c0_8 = arith.constant 0 : index
    %c0_9 = arith.constant 0 : index
    %c0_10 = arith.constant 0 : index
    %16 = vector.load %arg6[%c0_8, %c0_9, %c0_10] : memref<1x64x1xf32, #tpu.memory_space<vmem>>, vector<1x64x1xf32>
    %17 = vector.shape_cast %16 : vector<1x64x1xf32> to vector<64x1xf32>
    %18 = vector.shape_cast %15 : vector<64x1xf32> to vector<1x64x1xf32>
    tpu.vector_store %arg6[%c0_8, %c0_9, %c0_10], %18 {strides = array<i32>} : memref<1x64x1xf32, #tpu.memory_space<vmem>>, vector<1x64x1xf32>,
    %cst_11 = arith.constant 2.000000e+00 : f32
    %19 = vector.broadcast %cst_11 : f32 to vector<64x256xf32>
    %20 = arith.mulf %19, %6 : vector<64x256xf32>
    %21 = vector.broadcast %15 : vector<64x1xf32> to vector<64x256xf32>
    %22 = arith.subf %20, %21 : vector<64x256xf32>
    %cst_12 = arith.constant dense<0xFF800000> : vector<256xf32>
    %23 = vector.multi_reduction <maximumf>, %22, %cst_12 [0] : vector<64x256xf32> to vector<256xf32>
    %24 = vector.shape_cast %23 : vector<256xf32> to vector<1x256xf32>
    %c64_i32 = arith.constant 64 : i32
    %25 = arith.muli %arg1, %c64_i32 : i32
    %26 = tpu.iota {dimensions = array<i32: 0>} : vector<64x256xi32>
    %27 = vector.broadcast %25 : i32 to vector<64x256xi32>
    %28 = arith.addi %27, %26 : vector<64x256xi32>
    %29 = vector.broadcast %24 : vector<1x256xf32> to vector<64x256xf32>
    %30 = arith.cmpf oeq, %22, %29 : vector<64x256xf32>
    %c1073741824_i32 = arith.constant 1073741824 : i32
    %31 = vector.broadcast %c1073741824_i32 : i32 to vector<64x256xi32>
    %32 = arith.select %30, %28, %31 : vector<64x256xi1>, vector<64x256xi32>
    %cst_13 = arith.constant dense<2147483647> : vector<256xi32>
    %33 = vector.multi_reduction <minsi>, %32, %cst_13 [0] : vector<64x256xi32> to vector<256xi32>
    %34 = vector.shape_cast %33 : vector<256xi32> to vector<1x256xi32>
    %cst_14 = arith.constant dense<0xFF800000> : vector<1xf32>
    %35 = vector.multi_reduction <maximumf>, %8, %cst_14 [0] : vector<64x1xf32> to vector<1xf32>
    %36 = vector.shape_cast %35 : vector<1xf32> to vector<1x1xf32>
    %37 = vector.broadcast %36 : vector<1x1xf32> to vector<64x1xf32>
    %38 = arith.subf %8, %37 : vector<64x1xf32>
    %39 = math.exp %38 : vector<64x1xf32>
    %40 = vector.broadcast %39 : vector<64x1xf32> to vector<64x256xf32>
    %41 = arith.mulf %11, %40 : vector<64x256xf32>
    %cst_15 = arith.constant dense<0.000000e+00> : vector<256xf32>
    %42 = vector.multi_reduction <add>, %41, %cst_15 [0] : vector<64x256xf32> to vector<256xf32>
    %43 = vector.shape_cast %42 : vector<256xf32> to vector<1x256xf32>
    %c0_i32 = arith.constant 0 : i32
    %44 = arith.cmpi eq, %arg1, %c0_i32 : i32
    %45 = arith.extui %44 : i1 to i32
    %c0_i32_16 = arith.constant 0 : i32
    %46 = arith.cmpi ne, %45, %c0_i32_16 : i32
    scf.if %46 {
      %cst_38 = arith.constant -1.000000e+30 : f32
      %75 = vector.broadcast %cst_38 : f32 to vector<1x256xf32>
      %c0_39 = arith.constant 0 : index
      %c0_40 = arith.constant 0 : index
      %76 = vector.load %arg7[%c0_39, %c0_40] : memref<1x256xf32, #tpu.memory_space<vmem>>, vector<1x256xf32>
      tpu.vector_store %arg7[%c0_39, %c0_40], %75 {strides = array<i32>} : memref<1x256xf32, #tpu.memory_space<vmem>>, vector<1x256xf32>,
      %cst_41 = arith.constant 0.000000e+00 : f32
      %77 = vector.broadcast %cst_41 : f32 to vector<1x256xf32>
      %c0_42 = arith.constant 0 : index
      %c0_43 = arith.constant 0 : index
      %78 = vector.load %arg8[%c0_42, %c0_43] : memref<1x256xf32, #tpu.memory_space<vmem>>, vector<1x256xf32>
      tpu.vector_store %arg8[%c0_42, %c0_43], %77 {strides = array<i32>} : memref<1x256xf32, #tpu.memory_space<vmem>>, vector<1x256xf32>,
      %cst_44 = arith.constant -1.000000e+30 : f32
      %79 = vector.broadcast %cst_44 : f32 to vector<1x256xf32>
      %c0_45 = arith.constant 0 : index
      %c0_46 = arith.constant 0 : index
      %80 = vector.load %arg9[%c0_45, %c0_46] : memref<1x256xf32, #tpu.memory_space<vmem>>, vector<1x256xf32>
      tpu.vector_store %arg9[%c0_45, %c0_46], %79 {strides = array<i32>} : memref<1x256xf32, #tpu.memory_space<vmem>>, vector<1x256xf32>,
      %c0_i32_47 = arith.constant 0 : i32
      %81 = vector.broadcast %c0_i32_47 : i32 to vector<1x256xi32>
      %c0_48 = arith.constant 0 : index
      %c0_49 = arith.constant 0 : index
      %c0_50 = arith.constant 0 : index
      %82 = vector.load %arg5[%c0_48, %c0_49, %c0_50] : memref<1x1x256xi32, #tpu.memory_space<vmem>>, vector<1x1x256xi32>
      %83 = vector.shape_cast %82 : vector<1x1x256xi32> to vector<1x256xi32>
      %84 = vector.shape_cast %81 : vector<1x256xi32> to vector<1x1x256xi32>
      tpu.vector_store %arg5[%c0_48, %c0_49, %c0_50], %84 {strides = array<i32>} : memref<1x1x256xi32, #tpu.memory_space<vmem>>, vector<1x1x256xi32>,
      %cst_51 = arith.constant 0.000000e+00 : f32
      %85 = vector.broadcast %cst_51 : f32 to vector<1x256xf32>
      %c0_52 = arith.constant 0 : index
      %c0_53 = arith.constant 0 : index
      %c0_54 = arith.constant 0 : index
      %86 = vector.load %arg4[%c0_52, %c0_53, %c0_54] : memref<1x1x256xf32, #tpu.memory_space<vmem>>, vector<1x1x256xf32>
      %87 = vector.shape_cast %86 : vector<1x1x256xf32> to vector<1x256xf32>
      %88 = vector.shape_cast %85 : vector<1x256xf32> to vector<1x1x256xf32>
      tpu.vector_store %arg4[%c0_52, %c0_53, %c0_54], %88 {strides = array<i32>} : memref<1x1x256xf32, #tpu.memory_space<vmem>>, vector<1x1x256xf32>,
    } else {
    }
    %c0_17 = arith.constant 0 : index
    %c0_18 = arith.constant 0 : index
    %47 = vector.load %arg7[%c0_17, %c0_18] : memref<1x256xf32, #tpu.memory_space<vmem>>, vector<1x256xf32>
    %48 = vector.broadcast %36 : vector<1x1xf32> to vector<1x256xf32>
    %49 = arith.maximumf %47, %48 : vector<1x256xf32>
    %c0_19 = arith.constant 0 : index
    %c0_20 = arith.constant 0 : index
    %50 = vector.load %arg8[%c0_19, %c0_20] : memref<1x256xf32, #tpu.memory_space<vmem>>, vector<1x256xf32>
    %51 = arith.subf %47, %49 : vector<1x256xf32>
    %52 = math.exp %51 : vector<1x256xf32>
    %53 = arith.mulf %50, %52 : vector<1x256xf32>
    %54 = vector.broadcast %36 : vector<1x1xf32> to vector<1x256xf32>
    %55 = arith.subf %54, %49 : vector<1x256xf32>
    %56 = math.exp %55 : vector<1x256xf32>
    %57 = arith.mulf %43, %56 : vector<1x256xf32>
    %58 = arith.addf %53, %57 : vector<1x256xf32>
    %c0_21 = arith.constant 0 : index
    %c0_22 = arith.constant 0 : index
    %59 = vector.load %arg8[%c0_21, %c0_22] : memref<1x256xf32, #tpu.memory_space<vmem>>, vector<1x256xf32>
    tpu.vector_store %arg8[%c0_21, %c0_22], %58 {strides = array<i32>} : memref<1x256xf32, #tpu.memory_space<vmem>>, vector<1x256xf32>,
    %c0_23 = arith.constant 0 : index
    %c0_24 = arith.constant 0 : index
    %60 = vector.load %arg7[%c0_23, %c0_24] : memref<1x256xf32, #tpu.memory_space<vmem>>, vector<1x256xf32>
    tpu.vector_store %arg7[%c0_23, %c0_24], %49 {strides = array<i32>} : memref<1x256xf32, #tpu.memory_space<vmem>>, vector<1x256xf32>,
    %c0_25 = arith.constant 0 : index
    %c0_26 = arith.constant 0 : index
    %61 = vector.load %arg9[%c0_25, %c0_26] : memref<1x256xf32, #tpu.memory_space<vmem>>, vector<1x256xf32>
    %62 = arith.cmpf ogt, %24, %61 : vector<1x256xf32>
    %c0_27 = arith.constant 0 : index
    %c0_28 = arith.constant 0 : index
    %63 = vector.load %arg9[%c0_27, %c0_28] : memref<1x256xf32, #tpu.memory_space<vmem>>, vector<1x256xf32>
    %64 = arith.select %62, %24, %63 : vector<1x256xi1>, vector<1x256xf32>
    %c0_29 = arith.constant 0 : index
    %c0_30 = arith.constant 0 : index
    %65 = vector.load %arg9[%c0_29, %c0_30] : memref<1x256xf32, #tpu.memory_space<vmem>>, vector<1x256xf32>
    tpu.vector_store %arg9[%c0_29, %c0_30], %64 {strides = array<i32>} : memref<1x256xf32, #tpu.memory_space<vmem>>, vector<1x256xf32>,
    %c0_31 = arith.constant 0 : index
    %c0_32 = arith.constant 0 : index
    %c0_33 = arith.constant 0 : index
    %66 = vector.load %arg5[%c0_31, %c0_32, %c0_33] : memref<1x1x256xi32, #tpu.memory_space<vmem>>, vector<1x1x256xi32>
    %67 = vector.shape_cast %66 : vector<1x1x256xi32> to vector<1x256xi32>
    %68 = arith.select %62, %34, %67 : vector<1x256xi1>, vector<1x256xi32>
    %c0_34 = arith.constant 0 : index
    %c0_35 = arith.constant 0 : index
    %c0_36 = arith.constant 0 : index
    %69 = vector.load %arg5[%c0_34, %c0_35, %c0_36] : memref<1x1x256xi32, #tpu.memory_space<vmem>>, vector<1x1x256xi32>
    %70 = vector.shape_cast %69 : vector<1x1x256xi32> to vector<1x256xi32>
    %71 = vector.shape_cast %68 : vector<1x256xi32> to vector<1x1x256xi32>
    tpu.vector_store %arg5[%c0_34, %c0_35, %c0_36], %71 {strides = array<i32>} : memref<1x1x256xi32, #tpu.memory_space<vmem>>, vector<1x1x256xi32>,
    %c3_i32 = arith.constant 3 : i32
    %72 = arith.cmpi eq, %arg1, %c3_i32 : i32
    %73 = arith.extui %72 : i1 to i32
    %c0_i32_37 = arith.constant 0 : i32
    %74 = arith.cmpi ne, %73, %c0_i32_37 : i32
    scf.if %74 {
      %c0_38 = arith.constant 0 : index
      %c0_39 = arith.constant 0 : index
      %75 = vector.load %arg8[%c0_38, %c0_39] : memref<1x256xf32, #tpu.memory_space<vmem>>, vector<1x256xf32>
      %cst_40 = arith.constant 1.17549435E-38 : f32
      %76 = vector.broadcast %cst_40 : f32 to vector<1x256xf32>
      %77 = arith.maximumf %75, %76 : vector<1x256xf32>
      %c0_41 = arith.constant 0 : index
      %c0_42 = arith.constant 0 : index
      %78 = vector.load %arg7[%c0_41, %c0_42] : memref<1x256xf32, #tpu.memory_space<vmem>>, vector<1x256xf32>
      %79 = math.log %77 : vector<1x256xf32>
      %80 = arith.addf %78, %79 : vector<1x256xf32>
      %c0_43 = arith.constant 0 : index
      %c0_44 = arith.constant 0 : index
      %c0_45 = arith.constant 0 : index
      %81 = vector.load %arg4[%c0_43, %c0_44, %c0_45] : memref<1x1x256xf32, #tpu.memory_space<vmem>>, vector<1x1x256xf32>
      %82 = vector.shape_cast %81 : vector<1x1x256xf32> to vector<1x256xf32>
      %83 = vector.shape_cast %80 : vector<1x256xf32> to vector<1x1x256xf32>
      tpu.vector_store %arg4[%c0_43, %c0_44, %c0_45], %83 {strides = array<i32>} : memref<1x1x256xf32, #tpu.memory_space<vmem>>, vector<1x1x256xf32>,
    } else {
    }
    return
  }
  func.func @transform_0(%arg0: i32, %arg1: i32) -> (i32, i32, i32) {
    %c0_i32 = arith.constant 0 : i32
    %c0_i32_0 = arith.constant 0 : i32
    return %arg0, %arg1, %c0_i32 : i32, i32, i32
  }
  func.func @transform_1(%arg0: i32, %arg1: i32) -> (i32, i32, i32) {
    %c0_i32 = arith.constant 0 : i32
    %c0_i32_0 = arith.constant 0 : i32
    %c0_i32_1 = arith.constant 0 : i32
    return %arg0, %c0_i32, %c0_i32_0 : i32, i32, i32
  }
  func.func @transform_2(%arg0: i32, %arg1: i32) -> (i32, i32, i32) {
    %c0_i32 = arith.constant 0 : i32
    %c0_i32_0 = arith.constant 0 : i32
    %c0_i32_1 = arith.constant 0 : i32
    return %arg0, %c0_i32, %c0_i32_0 : i32, i32, i32
  }
  func.func @transform_3(%arg0: i32, %arg1: i32) -> (i32, i32, i32) {
    %c0_i32 = arith.constant 0 : i32
    %c0_i32_0 = arith.constant 0 : i32
    %c0_i32_1 = arith.constant 0 : i32
    return %arg0, %c0_i32, %c0_i32_0 : i32, i32, i32
  }
  func.func @transform_4(%arg0: i32, %arg1: i32) -> (i32, i32, i32) {
    %c0_i32 = arith.constant 0 : i32
    %c0_i32_0 = arith.constant 0 : i32
    return %arg0, %arg1, %c0_i32 : i32, i32, i32
  }
}

</mosaic_0001>

<bundles_post_ra>
// kernel: tpu_custom_call.1
= control target key start
LH: loop header
LB: loop body
LE: loop exit
PB: predicated region body
PF: predicated region fallthrough
CT: control target
= control target key end

     0   :  { %s2269_s0 = inlined_call_operand.vmem [shape: f32[2,256,32], index: 0, kind: input, shape index: {}]   ;;  %s2270_s1 = inlined_call_operand.vmem [shape: f32[2,256,32], index: 1, kind: input, shape index: {}]   ;;  %s2271_s2 = inlined_call_operand.hbm [shape: f32[2,1,256], index: 2, kind: output, shape index: {0}]   ;;  %s2272_s3 = inlined_call_operand.hbm [shape: s32[2,1,256], index: 3, kind: output, shape index: {1}]   ;;  %s2273_s4 = inlined_call_operand.vmem [shape: f32[2,256,1], index: 4, kind: output, shape index: {2}]  }
   0x1   :  { %2274 = sst [smem:[#allocation11_spill]] %s2269_s0 }
   0x2   :  { %2275 = sst [smem:[#allocation12_spill]] %s2270_s1 }
   0x3   :  { %10 = vsyncpa [#allocation6], 0 }
   0x4   :  { %12 = vsyncpa [#allocation6 + $0x1], 0 }
   0x5   :  { %13 = vsyncpa [#allocation8], 0 }
   0x6   :  { %15 = vsyncpa [#allocation8 + $0x1], 0  ;;  %s1586_s15 = smov 0   ;;  %s1588_s16 = smov 0  }
   0x7   :  { %s1590_s17 = smov 0   ;;  %s1592_s18 = smov 0  }
   0x8   :  { %s1594_s19 = smov 0   ;;  %s1596_s20 = smov 0  }
   0x9   :  { %s1598_s21 = smov 0   ;;  %s1600_s22 = smov 0  }
   0xa LB: > { %s1176_s23 = sadd.s32 4294967295, %s1556_s22   ;;  %s1177_s24 = sadd.s32 4294967294, %s1556_s22   ;;  %s1556_s22 = sphi %s1600_s22, %s21_s22   ;;  %s1552_s21 = sphi %s1598_s21, %s2288_s21   ;;  %s1548_s20 = sphi %s1596_s20, %s2287_s20   ;;  %s1544_s19 = sphi %s1594_s19, %s2286_s19   ;;  %s1540_s18 = sphi %s1592_s18, %s2285_s18   ;;  %s1536_s17 = sphi %s1590_s17, %s2284_s17   ;;  %s1532_s16 = sphi %s1588_s16, %s2283_s16   ;;  %s1528_s15 = sphi %s1586_s15, %s2282_s15  }
   0xb   : > { %s30_s25 = sadd.s32 1, %s1548_s20  ;;  %s33_s26 = sadd.s32 1, %s1552_s21 }
   0xc   : > { %p31_p0 = scmp.ge.s32.totalorder %s30_s25, 4  ;;  %p104_p1 = scmp.ne.s32.totalorder %s1536_s17, %s1532_s16 }
   0xd   : > { %p105_p2 = scmp.eq.s32.totalorder %s1176_s23, 7  ;;  %p110_p4 = scmp.ne.s32.totalorder %s1532_s16, %s1528_s15 }
   0xe   : > { %s2290_s25 = smov (%p31_p0, %s30_s25), 0  ;;  %s2292_s26 = smov (!%p31_p0, %s33_s26), %s1552_s21 }
   0xf   : > { %p1635_p3 = por %p105_p2, %p104_p1  ;;  %p35_p5 = scmp.ge.s32.totalorder %s2292_s26, 2 }
  0x10   : > { %p111_p6 = scmp.eq.s32.totalorder %s1177_s24, 7  ;;  %p1180_p7 = scmp.ge.s32.totalorder %s1556_s22, 1 }
  0x11   : > { %p204_p8 = scmp.lt.s32.totalorder %s1556_s22, 9  ;;  %s2294_s26 = smov (%p35_p5, %s2292_s26), 0 }
  0x12   : > { %p1645_p9 = por %p111_p6, %p110_p4  ;;  %s91_s29 = ssub.s32 %s1552_s21, %s2294_s26 }
  0x13   : > { %p205_p10 = pnand %p1180_p7, %p204_p8  ;;  %s94_s30 = sadd.s32 1, %s1536_s17 }
  0x14   : > { %p92_p11 = scmp.eq.s32.totalorder %s91_s29, 0  ;;  %s1656_s6 = sand.u32 (!%p205_p10), 1, %s1532_s16  }
  0x15   : > { %208 = sbr.rel (%p205_p10) target bundleno = 641 (0x281), region = 28  ;;  %p254_p12 = scmp.lt.s32.totalorder (!%p205_p10), %s1544_s19, 1 }
  0x16   : > { %s1653_s5 = scalar_select %p92_p11, %s1536_s17, %s94_s30  }
  0x17   : > { %s1181_s7 = sshll.u32 (!%p205_p10), %s1656_s6, 1  ;;  %s2278_s1 = sld [smem:[#allocation12_spill]] (!%p205_p10) }
  0x18   : > { %s1183_s13 = sshll.u32 (!%p205_p10), %s1540_s18, 3  ;;  %s2279_s0 = sld [smem:[#allocation11_spill]] (!%p205_p10) }
  0x19   : > { %p256_p13 = scmp.lt.s32.totalorder (!%p205_p10), %s1183_s13, 31  ;;  %p1240_p0 = scmp.ne.s32.totalorder (!%p205_p10), %s1540_s18, 0 }
  0x1a   : > { %s1661_s8 = scalar_select %p254_p12, %s1544_s19, 1  ;;  %vm326_vm0 = vcmask 261120   ;;  %vm649_vm1 = vcmask 7168  }
  0x1b   : > { %s2296_s13 = smov (!%p256_p13, %s1183_s13), 31 }
  0x1c   : > { %s1248_s9 = sshll.u32 %s1661_s8, 8  ;;  %s1184_s14 = sshll.u32 %s1661_s8, 5 }
  0x1d   : > { %s1667_s12 = scalar_lea.vmem %s2278_s1, %s1248_s9  ;;  %s1745_s23 = sadd.s32 %s1184_s14, %s2296_s13 }
  0x1e   : > { %v301_v0 = vld [vmem:[%s1667_s12 + $0x78] sm:$0xff]  ;;  %v300_v2 = vld [vmem:[%s1667_s12 + $0x70] sm:$0xff]  ;;  %v299_v4 = vld [vmem:[%s1667_s12 + $0x68] sm:$0xff]  ;;  %s1185_s24 = sshll.u32 %s1745_s23, 3  ;;  %s2170_s13 = scalar_lea.vmem [#allocation5], %s1181_s7 }
  0x1f   : > { %v317_v1 = vld [vmem:[%s1667_s12 + $0xf8] sm:$0xff]  ;;  %1191 = vmatpush.xpose.msk.msra.mxu0 %vm326_vm0, %v301_v0  ;;  %1249 = vmatpush.xpose.msk.msra.mxu2 %vm326_vm0, %v301_v0  ;;  %v316_v3 = vld [vmem:[%s1667_s12 + $0xf0] sm:$0xff]  ;;  %v315_v5 = vld [vmem:[%s1667_s12 + $0xe8] sm:$0xff]  ;;  %s1764_s8 = scalar_lea.vmem %s2279_s0, %s1185_s24  ;;  %s1992_s11 = scalar_lea.vmem %s2273_s4, %s1185_s24 }
  0x20   : > { %1215 = vmatpush.xpose.msk.msra.mxu1 %vm326_vm0, %v317_v1  ;;  %1265 = vmatpush.xpose.msk.msra.mxu3 %vm326_vm0, %v317_v1  ;;  %v298_v6 = vld [vmem:[%s1667_s12 + $0x60] sm:$0xff]  ;;  %v297_v8 = vld [vmem:[%s1667_s12 + $0x58] sm:$0xff]  ;;  %v296_v10 = vld [vmem:[%s1667_s12 + $0x50] sm:$0xff]  ;;  %s2174_s14 = scalar_lea.vmem [#allocation7], %s1181_s7 }
  0x21   : > { %v314_v7 = vld [vmem:[%s1667_s12 + $0xe0] sm:$0xff]  ;;  %v313_v9 = vld [vmem:[%s1667_s12 + $0xd8] sm:$0xff]  ;;  %v312_v11 = vld [vmem:[%s1667_s12 + $0xd0] sm:$0xff] }
  0x22   : > { %v295_v12 = vld [vmem:[%s1667_s12 + $0x48] sm:$0xff]  ;;  %v294_v14 = vld [vmem:[%s1667_s12 + $0x40] sm:$0xff]  ;;  %v293_v16 = vld [vmem:[%s1667_s12 + $0x38] sm:$0xff] }
  0x23   : > { %1192 = vmatpush.xpose.msk.msra.mxu0 %vm326_vm0, %v300_v2  ;;  %1250 = vmatpush.xpose.msk.msra.mxu2 %vm326_vm0, %v300_v2  ;;  %v311_v13 = vld [vmem:[%s1667_s12 + $0xc8] sm:$0xff]  ;;  %v310_v15 = vld [vmem:[%s1667_s12 + $0xc0] sm:$0xff]  ;;  %v309_v17 = vld [vmem:[%s1667_s12 + $0xb8] sm:$0xff] }
  0x24   : > { %1216 = vmatpush.xpose.msk.msra.mxu1 %vm326_vm0, %v316_v3  ;;  %1266 = vmatpush.xpose.msk.msra.mxu3 %vm326_vm0, %v316_v3  ;;  %v292_v18 = vld [vmem:[%s1667_s12 + $0x30] sm:$0xff]  ;;  %v291_v20 = vld [vmem:[%s1667_s12 + $0x28] sm:$0xff]  ;;  %v290_v22 = vld [vmem:[%s1667_s12 + $0x20] sm:$0xff] }
  0x25   : > { %v308_v19 = vld [vmem:[%s1667_s12 + $0xb0] sm:$0xff]  ;;  %v307_v21 = vld [vmem:[%s1667_s12 + $0xa8] sm:$0xff]  ;;  %v306_v23 = vld [vmem:[%s1667_s12 + $0xa0] sm:$0xff] }
  0x26   : > { %v289_v24 = vld [vmem:[%s1667_s12 + $0x18] sm:$0xff]  ;;  %v288_v26 = vld [vmem:[%s1667_s12 + $0x10] sm:$0xff]  ;;  %v287_v28 = vld [vmem:[%s1667_s12 + $0x8] sm:$0xff] }
  0x27   : > { %1193 = vmatpush.xpose.msk.msra.mxu0 %vm326_vm0, %v299_v4  ;;  %1251 = vmatpush.xpose.msk.msra.mxu2 %vm326_vm0, %v299_v4  ;;  %v305_v25 = vld [vmem:[%s1667_s12 + $0x98] sm:$0xff]  ;;  %v304_v27 = vld [vmem:[%s1667_s12 + $0x90] sm:$0xff]  ;;  %v303_v29 = vld [vmem:[%s1667_s12 + $0x88] sm:$0xff] }
  0x28   : > { %1217 = vmatpush.xpose.msk.msra.mxu1 %vm326_vm0, %v315_v5  ;;  %1267 = vmatpush.xpose.msk.msra.mxu3 %vm326_vm0, %v315_v5  ;;  %v278_v30 = vld [vmem:[%s1764_s8] sm:$0xff]  ;;  %v279_v36 = vld [vmem:[%s1764_s8 + $0x8] sm:$0xff]  ;;  %v280_v40 = vld [vmem:[%s1764_s8 + $0x10] sm:$0xff] }
  0x29   : > { %v282_v31 = vld [vmem:[%s1764_s8 + $0x20] sm:$0xff]  ;;  %v318_v34 = vmul.f32 0.3125, %v278_v30  ;;  %v283_v37 = vld [vmem:[%s1764_s8 + $0x28] sm:$0xff]  ;;  %v319_v38 = vmul.f32 0.3125, %v279_v36  ;;  %v284_v41 = vld [vmem:[%s1764_s8 + $0x30] sm:$0xff]  ;;  %v320_v42 = vmul.f32 0.3125, %v280_v40 }
  0x2a   : > { %v286_v32 = vld [vmem:[%s1667_s12] sm:$0xff]  ;;  %v322_v35 = vmul.f32 0.3125, %v282_v31  ;;  %v323_v39 = vmul.f32 0.3125, %v283_v37  ;;  %v324_v43 = vmul.f32 0.3125, %v284_v41  ;;  %v281_v44 = vld [vmem:[%s1764_s8 + $0x18] sm:$0xff] }
  0x2b   : > { %1194 = vmatpush.xpose.msk.msra.mxu0 %vm326_vm0, %v298_v6  ;;  %1252 = vmatpush.xpose.msk.msra.mxu2 %vm326_vm0, %v298_v6  ;;  %v302_v33 = vld [vmem:[%s1667_s12 + $0x80] sm:$0xff]  ;;  %v285_v45 = vld [vmem:[%s1764_s8 + $0x38] sm:$0xff]  ;;  %v321_v46 = vmul.f32 0.3125, %v281_v44  ;;  %s1239_s12 = sshll.u32 %s1540_s18, 6 }
  0x2c   : > { %1218 = vmatpush.xpose.msk.msra.mxu1 %vm326_vm0, %v314_v7  ;;  %1268 = vmatpush.xpose.msk.msra.mxu3 %vm326_vm0, %v314_v7  ;;  %v325_v47 = vmul.f32 0.3125, %v285_v45 }
  0x2f   : > { %1195 = vmatpush.xpose.msk.msra.mxu0 %vm326_vm0, %v297_v8  ;;  %1253 = vmatpush.xpose.msk.msra.mxu2 %vm326_vm0, %v297_v8 }
  0x30   : > { %1219 = vmatpush.xpose.msk.msra.mxu1 %vm326_vm0, %v313_v9  ;;  %1269 = vmatpush.xpose.msk.msra.mxu3 %vm326_vm0, %v313_v9 }
  0x33   : > { %1196 = vmatpush.xpose.msk.msra.mxu0 %vm326_vm0, %v296_v10  ;;  %1254 = vmatpush.xpose.msk.msra.mxu2 %vm326_vm0, %v296_v10 }
  0x34   : > { %1220 = vmatpush.xpose.msk.msra.mxu1 %vm326_vm0, %v312_v11  ;;  %1270 = vmatpush.xpose.msk.msra.mxu3 %vm326_vm0, %v312_v11 }
  0x37   : > { %1197 = vmatpush.xpose.msk.msra.mxu0 %vm326_vm0, %v295_v12  ;;  %1255 = vmatpush.xpose.msk.msra.mxu2 %vm326_vm0, %v295_v12 }
  0x38   : > { %1221 = vmatpush.xpose.msk.msra.mxu1 %vm326_vm0, %v311_v13  ;;  %1271 = vmatpush.xpose.msk.msra.mxu3 %vm326_vm0, %v311_v13 }
  0x3b   : > { %1198 = vmatpush.xpose.msk.msra.mxu0 %vm326_vm0, %v294_v14  ;;  %1256 = vmatpush.xpose.msk.msra.mxu2 %vm326_vm0, %v294_v14 }
  0x3c   : > { %1222 = vmatpush.xpose.msk.msra.mxu1 %vm326_vm0, %v310_v15  ;;  %1272 = vmatpush.xpose.msk.msra.mxu3 %vm326_vm0, %v310_v15 }
  0x3f   : > { %1199 = vmatpush.xpose.msk.msra.mxu0 %vm326_vm0, %v293_v16  ;;  %1257 = vmatpush.xpose.msk.msra.mxu2 %vm326_vm0, %v293_v16 }
  0x40   : > { %1223 = vmatpush.xpose.msk.msra.mxu1 %vm326_vm0, %v309_v17  ;;  %1273 = vmatpush.xpose.msk.msra.mxu3 %vm326_vm0, %v309_v17 }
  0x43   : > { %1200 = vmatpush.xpose.msk.msra.mxu0 %vm326_vm0, %v292_v18  ;;  %1258 = vmatpush.xpose.msk.msra.mxu2 %vm326_vm0, %v292_v18 }
  0x44   : > { %1224 = vmatpush.xpose.msk.msra.mxu1 %vm326_vm0, %v308_v19  ;;  %1274 = vmatpush.xpose.msk.msra.mxu3 %vm326_vm0, %v308_v19 }
  0x47   : > { %1201 = vmatpush.xpose.msk.msra.mxu0 %vm326_vm0, %v291_v20  ;;  %1259 = vmatpush.xpose.msk.msra.mxu2 %vm326_vm0, %v291_v20 }
  0x48   : > { %1225 = vmatpush.xpose.msk.msra.mxu1 %vm326_vm0, %v307_v21  ;;  %1275 = vmatpush.xpose.msk.msra.mxu3 %vm326_vm0, %v307_v21 }
  0x4b   : > { %1202 = vmatpush.xpose.msk.msra.mxu0 %vm326_vm0, %v290_v22  ;;  %1260 = vmatpush.xpose.msk.msra.mxu2 %vm326_vm0, %v290_v22 }
  0x4c   : > { %1226 = vmatpush.xpose.msk.msra.mxu1 %vm326_vm0, %v306_v23  ;;  %1276 = vmatpush.xpose.msk.msra.mxu3 %vm326_vm0, %v306_v23 }
  0x4f   : > { %1203 = vmatpush.xpose.msk.msra.mxu0 %vm326_vm0, %v289_v24  ;;  %1261 = vmatpush.xpose.msk.msra.mxu2 %vm326_vm0, %v289_v24 }
  0x50   : > { %1227 = vmatpush.xpose.msk.msra.mxu1 %vm326_vm0, %v305_v25  ;;  %1277 = vmatpush.xpose.msk.msra.mxu3 %vm326_vm0, %v305_v25 }
  0x53   : > { %1204 = vmatpush.xpose.msk.msra.mxu0 %vm326_vm0, %v288_v26  ;;  %1262 = vmatpush.xpose.msk.msra.mxu2 %vm326_vm0, %v288_v26 }
  0x54   : > { %1228 = vmatpush.xpose.msk.msra.mxu1 %vm326_vm0, %v304_v27  ;;  %1278 = vmatpush.xpose.msk.msra.mxu3 %vm326_vm0, %v304_v27 }
  0x57   : > { %1205 = vmatpush.xpose.msk.msra.mxu0 %vm326_vm0, %v287_v28  ;;  %1263 = vmatpush.xpose.msk.msra.mxu2 %vm326_vm0, %v287_v28 }
  0x58   : > { %1229 = vmatpush.xpose.msk.msra.mxu1 %vm326_vm0, %v303_v29  ;;  %1279 = vmatpush.xpose.msk.msra.mxu3 %vm326_vm0, %v303_v29 }
  0x5b   : > { %1206 = vmatpush.xpose.msk.msra.mxu0 %vm326_vm0, %v286_v32  ;;  %1264 = vmatpush.xpose.msk.msra.mxu2 %vm326_vm0, %v286_v32 }
  0x5c   : > { %1230 = vmatpush.xpose.msk.msra.mxu1 %vm326_vm0, %v302_v33  ;;  %1280 = vmatpush.xpose.msk.msra.mxu3 %vm326_vm0, %v302_v33 }
  0x5e   : > { %1207 = vmatmul.msk.f32.vlgmr.msra.gmra.mxu0 %vm326_vm0, %v318_v34  ;;  %1211 = vmatmul.msk.f32.vlgmr.msra.gmra.mxu2 %vm326_vm0, %v322_v35 }
  0x5f   : > { %1231 = vmatmul.msk.f32.vlgmr.msra.gmra.mxu1 %vm326_vm0, %v318_v34  ;;  %1235 = vmatmul.msk.f32.vlgmr.msra.gmra.mxu3 %vm326_vm0, %v322_v35 }
  0x66   : > { %1208 = vmatmul.msk.f32.gmra.mxu0 %vm326_vm0, %v319_v38  ;;  %1212 = vmatmul.msk.f32.gmra.mxu2 %vm326_vm0, %v323_v39 }
  0x67   : > { %1232 = vmatmul.msk.f32.gmra.mxu1 %vm326_vm0, %v319_v38  ;;  %1236 = vmatmul.msk.f32.gmra.mxu3 %vm326_vm0, %v323_v39 }
  0x6e   : > { %1209 = vmatmul.msk.f32.gmra.mxu0 %vm326_vm0, %v320_v42  ;;  %1213 = vmatmul.msk.f32.gmra.mxu2 %vm326_vm0, %v324_v43 }
  0x6f   : > { %1233 = vmatmul.msk.f32.gmra.mxu1 %vm326_vm0, %v320_v42  ;;  %1237 = vmatmul.msk.f32.gmra.mxu3 %vm326_vm0, %v324_v43 }
  0x76   : > { %1210 = vmatmul.msk.f32.gmra.mxu0 %vm326_vm0, %v321_v46  ;;  %1214 = vmatmul.msk.f32.gmra.mxu2 %vm326_vm0, %v325_v47 }
  0x77   : > { %1234 = vmatmul.msk.f32.gmra.mxu1 %vm326_vm0, %v321_v46  ;;  %1238 = vmatmul.msk.f32.gmra.mxu3 %vm326_vm0, %v325_v47 }
  0xdb   : > { %v1801_v48 = vpop.f32.mrf.mxu0 }
  0xdc   : > { %v1803_v49 = vpop.f32.mrf.mxu1 }
  0xdd   : > { %v529_v50 = vmax.f32 %v1801_v48, %v1803_v49 }
  0xdf   : > { %530 = vmax.xlane.f32.xlu0 %v529_v50 }
  0xe1   : > { %v1807_v51 = vpop.f32.mrf.mxu2 }
  0xe2   : > { %v1809_v52 = vpop.f32.mrf.mxu3 }
  0xe3   : > { %v1811_v53 = vpop.f32.mrf.mxu0  ;;  %v541_v54 = vmax.f32 %v1807_v51, %v1809_v52 }
  0xe4   : > { %v1815_v55 = vpop.f32.mrf.mxu1 }
  0xe5   : > { %542 = vmax.xlane.f32.xlu2 %v541_v54  ;;  %v532_v56 = vmax.f32 %v1811_v53, %v1815_v55 }
  0xe7   : > { %533 = vmax.xlane.f32.xlu0 %v532_v56 }
  0xe9   : > { %v1819_v57 = vpop.f32.mrf.mxu2 }
  0xea   : > { %v1821_v58 = vpop.f32.mrf.mxu3 }
  0xeb   : > { %v1823_v59 = vpop.f32.mrf.mxu0  ;;  %v544_v60 = vmax.f32 %v1819_v57, %v1821_v58 }
  0xec   : > { %v1827_v61 = vpop.f32.mrf.mxu1 }
  0xed   : > { %545 = vmax.xlane.f32.xlu2 %v544_v60  ;;  %v535_v62 = vmax.f32 %v1823_v59, %v1827_v61 }
  0xef   : > { %536 = vmax.xlane.f32.xlu1 %v535_v62 }
  0xf1   : > { %v1831_v63 = vpop.f32.mrf.mxu2 }
  0xf2   : > { %v1833_v0 = vpop.f32.mrf.mxu3 }
  0xf3   : > { %v1835_v1 = vpop.f32.mrf.mxu0  ;;  %v547_v2 = vmax.f32 %v1831_v63, %v1833_v0 }
  0xf4   : > { %v1839_v3 = vpop.f32.mrf.mxu1 }
  0xf5   : > { %548 = vmax.xlane.f32.xlu0 %v547_v2  ;;  %v538_v4 = vmax.f32 %v1835_v1, %v1839_v3 }
  0xf7   : > { %539 = vmax.xlane.f32.xlu1 %v538_v4 }
  0xf9   : > { %v1843_v5 = vpop.f32.mrf.mxu2 }
  0xfa   : > { %v1845_v6 = vpop.f32.mrf.mxu3 }
  0xfb   : > { %v550_v7 = vmax.f32 %v1843_v5, %v1845_v6 }
  0xff   : > { %551 = vmax.xlane.f32.xlu1 %v550_v7 }
 0x152   : > { %v1849_v8 = vpop.xlane.xlu0 %530 }
 0x153   : > { %v553_v9 = vsub.f32 %v1801_v48, %v1849_v8  ;;  %v554_v10 = vsub.f32 %v1803_v49, %v1849_v8 }
 0x155   : > { %v569_v11 = vmul.f32 1.442695, %v553_v9  ;;  %v571_v12 = vmul.f32 1.442695, %v554_v10 }
 0x157   : > { %1360 = vpow2.f32 %v569_v11 }
 0x158   : > { %v1855_v13 = vpop.xlane.xlu2 %542  ;;  %1362 = vpow2.f32 %v571_v12 }
 0x159   : > { %v561_v14 = vsub.f32 %v1807_v51, %v1855_v13  ;;  %v562_v15 = vsub.f32 %v1809_v52, %v1855_v13  ;;  %v813_v9 = vmax.f32 %v1849_v8, %v1855_v13 }
 0x15a   : > { %v1861_v16 = vpop.xlane.xlu0 %533 }
 0x15b   : > { %v555_v17 = vsub.f32 %v1811_v53, %v1861_v16  ;;  %v585_v18 = vmul.f32 1.442695, %v561_v14  ;;  %v587_v19 = vmul.f32 1.442695, %v562_v15  ;;  %v556_v20 = vsub.f32 %v1815_v55, %v1861_v16 }
 0x15d   : > { %v1867_v21 = vpop.eup %1360  ;;  %1364 = vpow2.f32 %v585_v18  ;;  %v573_v24 = vmul.f32 1.442695, %v555_v17  ;;  %v575_v25 = vmul.f32 1.442695, %v556_v20 }
 0x15e   : > { %v1869_v22 = vpop.eup %1362  ;;  %1366 = vpow2.f32 %v587_v19 }
 0x15f   : > { %v601_v23 = vadd.f32 %v1869_v22, %v1867_v21  ;;  %1368 = vpow2.f32 %v573_v24 }
 0x160   : > { %v1873_v26 = vpop.xlane.xlu2 %545  ;;  %1370 = vpow2.f32 %v575_v25 }
 0x161   : > { %602 = vadd.xlane.f32.xlu2 %v601_v23  ;;  %v563_v32 = vsub.f32 %v1819_v57, %v1873_v26  ;;  %v564_v36 = vsub.f32 %v1821_v58, %v1873_v26  ;;  %v814_v2 = vmax.f32 %v1861_v16, %v1873_v26 }
 0x162   : > { %v1875_v27 = vpop.xlane.xlu1 %536 }
 0x163   : > { %v1877_v28 = vpop.eup %1364  ;;  %v557_v29 = vsub.f32 %v1823_v59, %v1875_v27  ;;  %v558_v30 = vsub.f32 %v1827_v61, %v1875_v27  ;;  %v589_v37 = vmul.f32 1.442695, %v563_v32  ;;  %v591_v42 = vmul.f32 1.442695, %v564_v36 }
 0x164   : > { %v1883_v31 = vpop.eup %1366  ;;  %v817_v19 = vmax.f32 %v813_v9, %v814_v2 }
 0x165   : > { %v613_v33 = vadd.f32 %v1883_v31, %v1877_v28  ;;  %v577_v34 = vmul.f32 1.442695, %v557_v29  ;;  %v579_v35 = vmul.f32 1.442695, %v558_v30  ;;  %v1891_v38 = vpop.eup %1368 }
 0x166   : > { %v1893_v39 = vpop.eup %1370 }
 0x167   : > { %614 = vadd.xlane.f32.xlu0 %v613_v33  ;;  %1372 = vpow2.f32 %v577_v34  ;;  %v604_v47 = vadd.f32 %v1893_v39, %v1891_v38 }
 0x168   : > { %1374 = vpow2.f32 %v579_v35  ;;  %v1895_v40 = vpop.xlane.xlu0 %548 }
 0x169   : > { %1376 = vpow2.f32 %v589_v37  ;;  %v565_v46 = vsub.f32 %v1831_v63, %v1895_v40  ;;  %v566_v60 = vsub.f32 %v1833_v0, %v1895_v40  ;;  %v815_v12 = vmax.f32 %v1875_v27, %v1895_v40 }
 0x16a   : > { %v1897_v41 = vpop.xlane.xlu1 %539  ;;  %1378 = vpow2.f32 %v591_v42 }
 0x16b   : > { %v559_v43 = vsub.f32 %v1835_v1, %v1897_v41  ;;  %v560_v44 = vsub.f32 %v1839_v3, %v1897_v41  ;;  %v593_v4 = vmul.f32 1.442695, %v565_v46  ;;  %v595_v11 = vmul.f32 1.442695, %v566_v60 }
 0x16d   : > { %v1903_v45 = vpop.eup %1372  ;;  %v581_v50 = vmul.f32 1.442695, %v559_v43  ;;  %v583_v54 = vmul.f32 1.442695, %v560_v44 }
 0x16e   : > { %v1909_v56 = vpop.eup %1374 }
 0x16f   : > { %605 = vadd.xlane.f32.xlu0 %v604_v47  ;;  %v607_v62 = vadd.f32 %v1909_v56, %v1903_v45  ;;  %1380 = vpow2.f32 %v581_v50  ;;  %v1917_v7 = vpop.eup %1376 }
 0x170   : > { %1382 = vpow2.f32 %v583_v54  ;;  %v1931_v18 = vpop.eup %1378 }
 0x171   : > { %608 = vadd.xlane.f32.xlu1 %v607_v62  ;;  %1384 = vpow2.f32 %v593_v4  ;;  %v616_v32 = vadd.f32 %v1931_v18, %v1917_v7 }
 0x172   : > { %v1921_v10 = vpop.xlane.xlu1 %551  ;;  %1386 = vpow2.f32 %v595_v11 }
 0x173   : > { %v567_v14 = vsub.f32 %v1843_v5, %v1921_v10  ;;  %v568_v15 = vsub.f32 %v1845_v6, %v1921_v10  ;;  %v816_v17 = vmax.f32 %v1897_v41, %v1921_v10 }
 0x175   : > { %v1933_v20 = vpop.eup %1380  ;;  %v818_v23 = vmax.f32 %v815_v12, %v816_v17  ;;  %v597_v24 = vmul.f32 1.442695, %v567_v14  ;;  %v599_v25 = vmul.f32 1.442695, %v568_v15 }
 0x176   : > { %v1383_v29 = vpop.eup %1382 }
 0x177   : > { %v819_v30 = vmax.f32 %v817_v19, %v818_v23  ;;  %v610_v33 = vadd.f32 %v1383_v29, %v1933_v20  ;;  %1388 = vpow2.f32 %v597_v24  ;;  %v1938_v35 = vpop.eup %1384 }
 0x178   : > { %1390 = vpow2.f32 %v599_v25  ;;  %v1940_v37 = vpop.eup %1386 }
 0x179   : > { %v820_v34 = vrot.slane %v819_v30, 4  ;;  %617 = vadd.xlane.f32.xlu1 %v616_v32  ;;  %611 = vadd.xlane.f32.xlu2 %v610_v33  ;;  %v619_v47 = vadd.f32 %v1940_v37, %v1938_v35 }
 0x17b   : > { %v821_v36 = vmax.f32 %v819_v30, %v820_v34 }
 0x17d   : > { %v1942_v42 = vpop.eup %1388  ;;  %v822_v43 = vrot.slane %v821_v36, 2 }
 0x17e   : > { %v1944_v44 = vpop.eup %1390 }
 0x17f   : > { %v823_v46 = vmax.f32 %v821_v36, %v822_v43  ;;  %v622_v50 = vadd.f32 %v1944_v44, %v1942_v42 }
 0x181   : > { %v824_v54 = vrot.slane %v823_v46, 1  ;;  %620 = vadd.xlane.f32.xlu2 %v619_v47  ;;  %623 = vadd.xlane.f32.xlu0 %v622_v50 }
 0x183   : > { %v1950_v60 = vmax.f32 %v823_v46, %v824_v54 }
 0x185   : > { %v826_v62 = vsub.f32 %v1849_v8, %v1950_v60  ;;  %v827_v2 = vsub.f32 %v1861_v16, %v1950_v60  ;;  %v828_v4 = vsub.f32 %v1875_v27, %v1950_v60  ;;  %v829_v9 = vsub.f32 %v1897_v41, %v1950_v60 }
 0x186   : > { %v830_v12 = vsub.f32 %v1855_v13, %v1950_v60  ;;  %v831_v17 = vsub.f32 %v1873_v26, %v1950_v60  ;;  %v832_v24 = vsub.f32 %v1895_v40, %v1950_v60  ;;  %v833_v25 = vsub.f32 %v1921_v10, %v1950_v60 }
 0x187   : > { %v834_v11 = vmul.f32 1.442695, %v826_v62  ;;  %v836_v14 = vmul.f32 1.442695, %v827_v2  ;;  %v838_v15 = vmul.f32 1.442695, %v828_v4 }
 0x188   : > { %v840_v19 = vmul.f32 1.442695, %v829_v9  ;;  %v842_v23 = vmul.f32 1.442695, %v830_v12  ;;  %v844_v30 = vmul.f32 1.442695, %v831_v17 }
 0x189   : > { %1392 = vpow2.f32 %v834_v11  ;;  %v846_v32 = vmul.f32 1.442695, %v832_v24  ;;  %v848_v36 = vmul.f32 1.442695, %v833_v25 }
 0x18a   : > { %1394 = vpow2.f32 %v836_v14 }
 0x18b   : > { %1396 = vpow2.f32 %v838_v15 }
 0x18c   : > { %1398 = vpow2.f32 %v840_v19 }
 0x18d   : > { %1400 = vpow2.f32 %v842_v23 }
 0x18e   : > { %1402 = vpow2.f32 %v844_v30 }
 0x18f   : > { %v1393_v33 = vpop.eup %1392  ;;  %1404 = vpow2.f32 %v846_v32 }
 0x190   : > { %v1395_v34 = vpop.eup %1394  ;;  %v850_v43 = vmul.f32 %v1393_v33, %v1867_v21  ;;  %v851_v46 = vmul.f32 %v1393_v33, %v1869_v22  ;;  %1406 = vpow2.f32 %v848_v36 }
 0x191   : > { %v1397_v47 = vpop.eup %1396  ;;  %v852_v50 = vmul.f32 %v1395_v34, %v1891_v38  ;;  %v853_v54 = vmul.f32 %v1395_v34, %v1893_v39 }
 0x192   : > { %v1399_v62 = vpop.eup %1398  ;;  %v854_v2 = vmul.f32 %v1397_v47, %v1903_v45  ;;  %v855_v4 = vmul.f32 %v1397_v47, %v1909_v56 }
 0x193   : > { %v866_v9 = vadd.f32 %v852_v50, %v850_v43  ;;  %v879_v11 = vadd.f32 %v853_v54, %v851_v46  ;;  %v1401_v12 = vpop.eup %1400  ;;  %v856_v14 = vmul.f32 %v1399_v62, %v1933_v20  ;;  %v857_v21 = vmul.f32 %v1399_v62, %v1383_v29 }
 0x194   : > { %v1403_v17 = vpop.eup %1402  ;;  %v858_v38 = vmul.f32 %v1401_v12, %v1877_v28  ;;  %v859_v39 = vmul.f32 %v1401_v12, %v1883_v31 }
 0x195   : > { %v867_v15 = vadd.f32 %v866_v9, %v854_v2  ;;  %v880_v22 = vadd.f32 %v879_v11, %v855_v4  ;;  %v1405_v24 = vpop.eup %1404  ;;  %v860_v45 = vmul.f32 %v1403_v17, %v1917_v7  ;;  %v861_v56 = vmul.f32 %v1403_v17, %v1931_v18 }
 0x196   : > { %v1407_v32 = vpop.eup %1406  ;;  %v862_v20 = vmul.f32 %v1405_v24, %v1938_v35  ;;  %v863_v29 = vmul.f32 %v1405_v24, %v1940_v37 }
 0x197   : > { %v868_v19 = vadd.f32 %v867_v15, %v856_v14  ;;  %v881_v23 = vadd.f32 %v880_v22, %v857_v21  ;;  %v864_v31 = vmul.f32 %v1407_v32, %v1942_v42  ;;  %v865_v43 = vmul.f32 %v1407_v32, %v1944_v44 }
 0x199   : > { %v869_v25 = vadd.f32 %v868_v19, %v858_v38  ;;  %v882_v30 = vadd.f32 %v881_v23, %v859_v39 }
 0x19b   : > { %v870_v33 = vadd.f32 %v869_v25, %v860_v45  ;;  %v883_v34 = vadd.f32 %v882_v30, %v861_v56 }
 0x19d   : > { %v871_v36 = vadd.f32 %v870_v33, %v862_v20  ;;  %v884_v28 = vadd.f32 %v883_v34, %v863_v29 }
 0x19f   : > { %v872_v46 = vadd.f32 %v871_v36, %v864_v31  ;;  %v885_v47 = vadd.f32 %v884_v28, %v865_v43  ;;  %v663_v28 = vmul.f32 2.0, %v1827_v61  ;;  %v665_v43 = vmul.f32 2.0, %v1839_v3 }
 0x1a0   : > { %v661_v61 = vmul.f32 2.0, %v1815_v55 }
 0x1a1   : > { %v873_v7 = vrot.slane %v872_v46, 4  ;;  %v886_v50 = vrot.slane %v885_v47, 4 }
 0x1a3   : > { %v874_v18 = vadd.f32 %v873_v7, %v872_v46  ;;  %v887_v54 = vadd.f32 %v886_v50, %v885_v47  ;;  %v658_v47 = vmul.f32 2.0, %v1801_v48  ;;  %v659_v7 = vmul.f32 2.0, %v1803_v49 }
 0x1a4   : > { %v666_v48 = vmul.f32 2.0, %v1807_v51  ;;  %v667_v49 = vmul.f32 2.0, %v1809_v52 }
 0x1a5   : > { %v875_v62 = vrot.slane %v874_v18, 2  ;;  %v888_v2 = vrot.slane %v887_v54, 2 }
 0x1a7   : > { %v876_v35 = vadd.f32 %v875_v62, %v874_v18  ;;  %v889_v4 = vadd.f32 %v888_v2, %v887_v54  ;;  %v668_v62 = vmul.f32 2.0, %v1819_v57 }
 0x1a9   : > { %v877_v37 = vrot.slane %v876_v35, 1  ;;  %v890_v9 = vrot.slane %v889_v4, 1 }
 0x1ab   : > { %v1983_v11 = vadd.f32 %v877_v37, %v876_v35  ;;  %v1985_v12 = vadd.f32 %v890_v9, %v889_v4  ;;  %v670_v4 = vmul.f32 2.0, %v1831_v63  ;;  %v671_v9 = vmul.f32 2.0, %v1833_v0 }
 0x1ac   : > { %v672_v63 = vmul.f32 2.0, %v1843_v5 }
 0x1d4   : > { %v603_v42 = vpop.xlane.xlu2 %602 }
 0x1d5   : > { %1408 = vlog2.f32 %v603_v42 }
 0x1da   : > { %v615_v44 = vpop.xlane.xlu0 %614 }
 0x1db   : > { %v1409_v14 = vpop.eup %1408  ;;  %1410 = vlog2.f32 %v615_v44 }
 0x1dc   : > { %v626_v21 = vmul.f32 0.6931472, %v1409_v14 }
 0x1de   : > { %v641_v15 = vadd.f32 %v626_v21, %v1849_v8 }
 0x1e0   : > { %650 = vst.msk [vmem:[%s1992_s11] sm:$0xff] %vm649_vm1, %v641_v15  ;;  %v2030_v3 = vsub.f32 %v658_v47, %v641_v15 }
 0x1e1   : > { %v1411_v22 = vpop.eup %1410 }
 0x1e2   : > { %v634_v17 = vmul.f32 0.6931472, %v1411_v22  ;;  %v606_v38 = vpop.xlane.xlu0 %605 }
 0x1e3   : > { %1412 = vlog2.f32 %v606_v38 }
 0x1e4   : > { %v645_v39 = vadd.f32 %v634_v17, %v1855_v13  ;;  %v609_v19 = vpop.xlane.xlu1 %608 }
 0x1e5   : > { %1414 = vlog2.f32 %v609_v19 }
 0x1e6   : > { %654 = vst.msk [vmem:[%s1992_s11 + $0x20] sm:$0xff] %vm649_vm1, %v645_v39  ;;  %v2051_v44 = vsub.f32 %v666_v48, %v645_v39  ;;  %v2053_v14 = vsub.f32 %v667_v49, %v645_v39 }
 0x1e9   : > { %v1413_v23 = vpop.eup %1412 }
 0x1ea   : > { %v628_v24 = vmul.f32 0.6931472, %v1413_v23 }
 0x1eb   : > { %v1415_v45 = vpop.eup %1414 }
 0x1ec   : > { %v642_v56 = vadd.f32 %v628_v24, %v1861_v16  ;;  %v630_v8 = vmul.f32 0.6931472, %v1415_v45  ;;  %v612_v25 = vpop.xlane.xlu2 %611  ;;  %v618_v30 = vpop.xlane.xlu1 %617  ;;  %v662_v16 = vmul.f32 2.0, %v1823_v59  ;;  %v660_v59 = vmul.f32 2.0, %v1811_v53 }
 0x1ed   : > { %1416 = vlog2.f32 %v612_v25  ;;  %v669_v53 = vmul.f32 2.0, %v1821_v58  ;;  %v717_v25 = vlaneseq }
 0x1ee   : > { %651 = vst.msk [vmem:[%s1992_s11 + $0x8] sm:$0xff] %vm649_vm1, %v642_v56  ;;  %v643_v32 = vadd.f32 %v630_v8, %v1875_v27  ;;  %1418 = vlog2.f32 %v618_v30  ;;  %v664_v27 = vmul.f32 2.0, %v1835_v1  ;;  %v2036_v55 = vsub.f32 %v660_v59, %v642_v56 }
 0x1ef   : > { %v2038_v2 = vsub.f32 %v661_v61, %v642_v56 }
 0x1f0   : > { %652 = vst.msk [vmem:[%s1992_s11 + $0x10] sm:$0xff] %vm649_vm1, %v643_v32  ;;  %v2014_v50 = vsub.f32 %v662_v16, %v643_v32  ;;  %v2016_v18 = vsub.f32 %v663_v28, %v643_v32 }
 0x1f2   : > { %v690_v51 = vmax.f32 %v2030_v3, %v2014_v50 }
 0x1f3   : > { %v1417_v13 = vpop.eup %1416 }
 0x1f4   : > { %v1419_v20 = vpop.eup %1418  ;;  %v632_v29 = vmul.f32 0.6931472, %v1417_v13  ;;  %v621_v33 = vpop.xlane.xlu2 %620  ;;  %v692_v5 = vmax.f32 %v690_v51, %v2051_v44 }
 0x1f5   : > { %v624_v34 = vpop.xlane.xlu0 %623  ;;  %v636_v36 = vmul.f32 0.6931472, %v1419_v20  ;;  %1420 = vlog2.f32 %v621_v33 }
 0x1f6   : > { %v644_v31 = vadd.f32 %v632_v29, %v1897_v41  ;;  %1422 = vlog2.f32 %v624_v34  ;;  %v718_v29 = vshrl.u32 %v717_v25, 7 }
 0x1f7   : > { %v646_v46 = vadd.f32 %v636_v36, %v1873_v26  ;;  %v2032_v26 = vsub.f32 %v659_v7, %v641_v15  ;;  %v673_v15 = vmul.f32 2.0, %v1845_v6 }
 0x1f8   : > { %653 = vst.msk [vmem:[%s1992_s11 + $0x18] sm:$0xff] %vm649_vm1, %v644_v31  ;;  %v2022_v41 = vsub.f32 %v664_v27, %v644_v31  ;;  %v2024_v1 = vsub.f32 %v665_v43, %v644_v31  ;;  %v719_v28 = vadd.s32 8, %v718_v29  ;;  %v726_v31 = vstv %s1239_s12 }
 0x1f9   : > { %655 = vst.msk [vmem:[%s1992_s11 + $0x28] sm:$0xff] %vm649_vm1, %v646_v46  ;;  %v703_v52 = vmax.f32 %v2032_v26, %v2016_v18  ;;  %v2057_v22 = vsub.f32 %v668_v62, %v646_v46  ;;  %v2059_v0 = vsub.f32 %v669_v53, %v646_v46  ;;  %v720_v27 = vadd.s32 16, %v718_v29 }
 0x1fa   : > { %v691_v57 = vmax.f32 %v2036_v55, %v2022_v41  ;;  %v704_v58 = vmax.f32 %v2038_v2, %v2024_v1  ;;  %v721_v43 = vadd.s32 24, %v718_v29  ;;  %v722_v7 = vadd.s32 32, %v718_v29 }
 0x1fb   : > { %v1421_v54 = vpop.eup %1420  ;;  %v705_v39 = vmax.f32 %v703_v52, %v2053_v14  ;;  %v723_v59 = vadd.s32 40, %v718_v29  ;;  %v724_v61 = vadd.s32 48, %v718_v29  ;;  %v725_v48 = vadd.s32 56, %v718_v29 }
 0x1fc   : > { %v1423_v35 = vpop.eup %1422  ;;  %v638_v37 = vmul.f32 0.6931472, %v1421_v54  ;;  %v706_v6 = vmax.f32 %v704_v58, %v2059_v0  ;;  %v727_v62 = vadd.s32 %v726_v31, %v718_v29  ;;  %v728_v53 = vadd.s32 %v726_v31, %v719_v28 }
 0x1fd   : > { %v640_v42 = vmul.f32 0.6931472, %v1423_v35  ;;  %v729_v35 = vadd.s32 %v726_v31, %v720_v27  ;;  %v734_v58 = vadd.s32 %v726_v31, %v725_v48 }
 0x1fe   : > { %v647_v21 = vadd.f32 %v638_v37, %v1895_v40  ;;  %v693_v40 = vmax.f32 %v691_v57, %v2057_v22  ;;  %v731_v37 = vadd.s32 %v726_v31, %v722_v7  ;;  %v733_v57 = vadd.s32 %v726_v31, %v724_v61 }
 0x1ff   : > { %v648_v17 = vadd.f32 %v640_v42, %v1921_v10 }
 0x200   : > { %656 = vst.msk [vmem:[%s1992_s11 + $0x30] sm:$0xff] %vm649_vm1, %v647_v21  ;;  %v2064_v38 = vsub.f32 %v670_v4, %v647_v21  ;;  %v2066_v19 = vsub.f32 %v671_v9, %v647_v21  ;;  %v730_v4 = vadd.s32 %v726_v31, %v721_v43  ;;  %v732_v9 = vadd.s32 %v726_v31, %v723_v59 }
 0x201   : > { %657 = vst.msk [vmem:[%s1992_s11 + $0x38] sm:$0xff] %vm649_vm1, %v648_v17  ;;  %v2074_v23 = vsub.f32 %v672_v63, %v648_v17  ;;  %v2076_v10 = vsub.f32 %v673_v15, %v648_v17 }
 0x202   : > { %v694_v24 = vmax.f32 %v692_v5, %v2064_v38  ;;  %v707_v45 = vmax.f32 %v705_v39, %v2066_v19 }
 0x203   : > { %v695_v56 = vmax.f32 %v693_v40, %v2074_v23  ;;  %v708_v8 = vmax.f32 %v706_v6, %v2076_v10 }
 0x205   : > { %v696_v30 = vmax.f32 %v694_v24, %v695_v56  ;;  %v709_v32 = vmax.f32 %v707_v45, %v708_v8 }
 0x207   : > { %v697_v13 = vrot.slane %v696_v30, 4  ;;  %v710_v20 = vrot.slane %v709_v32, 4 }
 0x209   : > { %v698_v33 = vmax.f32 %v696_v30, %v697_v13  ;;  %v711_v34 = vmax.f32 %v709_v32, %v710_v20 }
 0x20b   : > { %v699_v36 = vrot.slane %v698_v33, 2  ;;  %v712_v16 = vrot.slane %v711_v34, 2 }
 0x20d   : > { %v700_v46 = vmax.f32 %v698_v33, %v699_v36  ;;  %v713_v47 = vmax.f32 %v711_v34, %v712_v16 }
 0x20f   : > { %v701_v49 = vrot.slane %v700_v46, 1  ;;  %v714_v54 = vrot.slane %v713_v47, 1 }
 0x211   : > { %v2084_v51 = vmax.f32 %v700_v46, %v701_v49  ;;  %v2086_v52 = vmax.f32 %v713_v47, %v714_v54 }
 0x213   : > { %vm735_vm2 = vcmp.eq.f32.partialorder %v2030_v3, %v2084_v51  ;;  %vm736_vm3 = vcmp.eq.f32.partialorder %v2032_v26, %v2086_v52  ;;  %vm737_vm4 = vcmp.eq.f32.partialorder %v2036_v55, %v2084_v51  ;;  %vm738_vm5 = vcmp.eq.f32.partialorder %v2038_v2, %v2086_v52 }
 0x214   : > { %vm739_vm6 = vcmp.eq.f32.partialorder %v2014_v50, %v2084_v51  ;;  %vm740_vm7 = vcmp.eq.f32.partialorder %v2016_v18, %v2086_v52  ;;  %vm741_vm8 = vcmp.eq.f32.partialorder %v2022_v41, %v2084_v51  ;;  %vm742_vm9 = vcmp.eq.f32.partialorder %v2024_v1, %v2086_v52 }
 0x215   : > { %vm743_vm10 = vcmp.eq.f32.partialorder %v2051_v44, %v2084_v51  ;;  %vm744_vm11 = vcmp.eq.f32.partialorder %v2053_v14, %v2086_v52  ;;  %vm745_vm12 = vcmp.eq.f32.partialorder %v2057_v22, %v2084_v51  ;;  %vm746_vm13 = vcmp.eq.f32.partialorder %v2059_v0, %v2086_v52 }
 0x216   : > { %vm747_vm14 = vcmp.eq.f32.partialorder %v2064_v38, %v2084_v51  ;;  %vm748_vm15 = vcmp.eq.f32.partialorder %v2066_v19, %v2086_v52  ;;  %vm749_vm0 = vcmp.eq.f32.partialorder %v2074_v23, %v2084_v51  ;;  %vm750_vm1 = vcmp.eq.f32.partialorder %v2076_v10, %v2086_v52 }
 0x217   : > { %v751_v42 = vsel %vm735_vm2, %v727_v62, 1073741824  ;;  %v752_v63 = vsel %vm736_vm3, %v727_v62, 1073741824  ;;  %v753_v21 = vsel %vm737_vm4, %v728_v53, 1073741824  ;;  %v754_v15 = vsel %vm738_vm5, %v728_v53, 1073741824 }
 0x218   : > { %v755_v17 = vsel %vm739_vm6, %v729_v35, 1073741824  ;;  %v756_v3 = vsel %vm740_vm7, %v729_v35, 1073741824  ;;  %v757_v26 = vsel %vm741_vm8, %v730_v4, 1073741824  ;;  %v758_v55 = vsel %vm742_vm9, %v730_v4, 1073741824 }
 0x219   : > { %v759_v2 = vsel %vm743_vm10, %v731_v37, 1073741824  ;;  %v760_v50 = vsel %vm744_vm11, %v731_v37, 1073741824  ;;  %v761_v18 = vsel %vm745_vm12, %v732_v9, 1073741824  ;;  %v762_v41 = vsel %vm746_vm13, %v732_v9, 1073741824 }
 0x21a   : > { %v763_v1 = vsel %vm747_vm14, %v733_v57, 1073741824  ;;  %v764_v44 = vsel %vm748_vm15, %v733_v57, 1073741824  ;;  %v765_v14 = vsel %vm749_vm0, %v734_v58, 1073741824  ;;  %v766_v22 = vsel %vm750_vm1, %v734_v58, 1073741824 }
 0x21b   : > { %vm767_vm2 = vcmp.lt.s32.totalorder %v751_v42, %v755_v17  ;;  %vm769_vm3 = vcmp.lt.s32.totalorder %v753_v21, %v757_v26  ;;  %vm790_vm4 = vcmp.lt.s32.totalorder %v752_v63, %v756_v3  ;;  %vm792_vm5 = vcmp.lt.s32.totalorder %v754_v15, %v758_v55 }
 0x21c   : > { %v768_v0 = vsel %vm767_vm2, %v751_v42, %v755_v17  ;;  %v770_v5 = vsel %vm769_vm3, %v753_v21, %v757_v26  ;;  %v791_v38 = vsel %vm790_vm4, %v752_v63, %v756_v3  ;;  %v793_v39 = vsel %vm792_vm5, %v754_v15, %v758_v55 }
 0x21d   : > { %vm771_vm6 = vcmp.lt.s32.totalorder %v768_v0, %v759_v2  ;;  %vm773_vm7 = vcmp.lt.s32.totalorder %v770_v5, %v761_v18  ;;  %vm794_vm8 = vcmp.lt.s32.totalorder %v791_v38, %v760_v50  ;;  %vm796_vm9 = vcmp.lt.s32.totalorder %v793_v39, %v762_v41 }
 0x21e   : > { %v772_v19 = vsel %vm771_vm6, %v768_v0, %v759_v2  ;;  %v774_v40 = vsel %vm773_vm7, %v770_v5, %v761_v18  ;;  %v795_v6 = vsel %vm794_vm8, %v791_v38, %v760_v50  ;;  %v797_v23 = vsel %vm796_vm9, %v793_v39, %v762_v41 }
 0x21f   : > { %vm775_vm10 = vcmp.lt.s32.totalorder %v772_v19, %v763_v1  ;;  %vm777_vm11 = vcmp.lt.s32.totalorder %v774_v40, %v765_v14  ;;  %vm798_vm12 = vcmp.lt.s32.totalorder %v795_v6, %v764_v44  ;;  %vm800_vm13 = vcmp.lt.s32.totalorder %v797_v23, %v766_v22 }
 0x220   : > { %v776_v10 = vsel %vm775_vm10, %v772_v19, %v763_v1  ;;  %v778_v24 = vsel %vm777_vm11, %v774_v40, %v765_v14  ;;  %v799_v45 = vsel %vm798_vm12, %v795_v6, %v764_v44  ;;  %v801_v56 = vsel %vm800_vm13, %v797_v23, %v766_v22 }
 0x221   : > { %vm779_vm14 = vcmp.lt.s32.totalorder %v776_v10, %v778_v24  ;;  %vm802_vm15 = vcmp.lt.s32.totalorder %v799_v45, %v801_v56 }
 0x222   : > { %v780_v8 = vsel %vm779_vm14, %v776_v10, %v778_v24  ;;  %v803_v30 = vsel %vm802_vm15, %v799_v45, %v801_v56 }
 0x223   : > { %v781_v32 = vrot.slane %v780_v8, 4  ;;  %v804_v13 = vrot.slane %v803_v30, 4 }
 0x225   : > { %vm782_vm0 = vcmp.lt.s32.totalorder %v780_v8, %v781_v32  ;;  %vm805_vm1 = vcmp.lt.s32.totalorder %v803_v30, %v804_v13 }
 0x226   : > { %v783_v20 = vsel %vm782_vm0, %v780_v8, %v781_v32  ;;  %v806_v29 = vsel %vm805_vm1, %v803_v30, %v804_v13 }
 0x227   : > { %v784_v33 = vrot.slane %v783_v20, 2  ;;  %v807_v34 = vrot.slane %v806_v29, 2 }
 0x229   : > { %vm785_vm2 = vcmp.lt.s32.totalorder %v783_v20, %v784_v33  ;;  %vm808_vm3 = vcmp.lt.s32.totalorder %v806_v29, %v807_v34 }
 0x22a   : > { %v786_v36 = vsel %vm785_vm2, %v783_v20, %v784_v33  ;;  %v809_v16 = vsel %vm808_vm3, %v806_v29, %v807_v34  ;;  %895 = sbr.rel (%p1240_p0) target bundleno = 565 (0x235), region = 32 }
 0x22b   : > { %v787_v28 = vrot.slane %v786_v36, 1  ;;  %v810_v31 = vrot.slane %v809_v16, 1 }
 0x22d   : > { %vm788_vm4 = vcmp.lt.s32.totalorder %v786_v36, %v787_v28  ;;  %vm811_vm5 = vcmp.lt.s32.totalorder %v809_v16, %v810_v31 }
 0x22e   : > { %v789_v27 = vsel %vm788_vm4, %v786_v36, %v787_v28  ;;  %v812_v43 = vsel %vm811_vm5, %v809_v16, %v810_v31 }
 0x22f   : > { %vm898_vm6 = vcmp.lt.s32.totalorder %v717_v25, 256  ;;  %v1558_v46 = vmov -1e+30   ;;  %v1559_v47 = vmov 0.0   ;;  %v1560_v7 = vmov 0  }
 0x230   : > { %900 = vst.msk [vmem:[#allocation2] sm:$0x3] %vm898_vm6, %v1558_v46 }
 0x231   : > { %902 = vst.msk [vmem:[#allocation4] sm:$0x3] %vm898_vm6, %v1558_v46 }
 0x232   : > { %901 = vst.msk [vmem:[#allocation3] sm:$0x3] %vm898_vm6, %v1559_v47 }
 0x233   : > { %904 = vst.msk [vmem:[%s2170_s13] sm:$0x3] %vm898_vm6, %v1559_v47 }
 0x234   : > { %903 = vst.msk [vmem:[%s2174_s14] sm:$0x3] %vm898_vm6, %v1560_v7 }
 0x235 PF: > { %vm2181_vm7 = vcmp.lt.s32.totalorder %v717_v25, 256  ;;  %vm925_vm10 = vcmask 1040384   ;;  %p1241_p1 = scmp.ne.s32.totalorder %s1540_s18, 3 }
 0x237   : > { %v905_v59 = vld [vmem:[#allocation2] sm:$0x3] }
 0x238   : > { %v906_v48 = vmax.f32 %v905_v59, %v1950_v60  ;;  %v935_v49 = vld [vmem:[#allocation4] sm:$0x3] }
 0x239   : > { %v937_v62 = vperm.slane %v935_v49, 0  ;;  %v938_v53 = vperm.slane %v935_v49, 1 }
 0x23a   : > { %v908_v37 = vsub.f32 %v905_v59, %v906_v48  ;;  %v912_v9 = vsub.f32 %v1950_v60, %v906_v48  ;;  %934 = vst.msk [vmem:[#allocation2] sm:$0x3] %vm2181_vm7, %v906_v48 }
 0x23b   : > { %v951_v54 = vld [vmem:[%s2174_s14] sm:$0x3]  ;;  %vm941_vm8 = vcmp.gt.f32.partialorder %v2084_v51, %v937_v62  ;;  %vm942_vm9 = vcmp.gt.f32.partialorder %v2086_v52, %v938_v53 }
 0x23c   : > { %v952_v35 = vperm.slane %v951_v54, 0  ;;  %v953_v4 = vperm.slane %v951_v54, 1  ;;  %v909_v25 = vmul.f32 1.442695, %v908_v37  ;;  %v913_v57 = vmul.f32 1.442695, %v912_v9 }
 0x23d   : > { %v943_v58 = vsel %vm941_vm8, %v2084_v51, %v937_v62  ;;  %v944_v42 = vsel %vm942_vm9, %v2086_v52, %v938_v53  ;;  %v907_v52 = vld [vmem:[#allocation3] sm:$0x3] }
 0x23e   : > { %v947_v63 = vrot.slane %v944_v42, 7  ;;  %v954_v21 = vsel %vm941_vm8, %v789_v27, %v952_v35  ;;  %v955_v15 = vsel %vm942_vm9, %v812_v43, %v953_v4  ;;  %1424 = vpow2.f32 %v913_v57 }
 0x23f   : > { %v956_v17 = vrot.slane %v955_v15, 7  ;;  %1426 = vpow2.f32 %v909_v25 }
 0x240   : > { %v948_v60 = vsel %vm925_vm10, %v943_v58, %v947_v63 }
 0x241   : > { %950 = vst.msk [vmem:[#allocation4] sm:$0x3] %vm2181_vm7, %v948_v60  ;;  %v957_v3 = vsel %vm925_vm10, %v954_v21, %v956_v17 }
 0x242   : > { %958 = vst.msk [vmem:[%s2174_s14] sm:$0x3] %vm2181_vm7, %v957_v3 }
 0x244   : > { %v1425_v51 = vpop.eup %1424 }
 0x245   : > { %v1427_v26 = vpop.eup %1426  ;;  %v916_v55 = vperm.slane %v1425_v51, 0  ;;  %v917_v2 = vperm.slane %v1425_v51, 1 }
 0x246   : > { %v911_v41 = vmul.f32 %v1427_v26, %v907_v52 }
 0x247   : > { %v920_v50 = vmul.f32 %v916_v55, %v1983_v11  ;;  %v921_v18 = vmul.f32 %v917_v2, %v1985_v12 }
 0x249   : > { %v924_v1 = vrot.slane %v921_v18, 7 }
 0x24a   : > { %962 = sbr.rel (%p1241_p1) target bundleno = 612 (0x264), region = 36 }
 0x24b   : > { %v926_v44 = vsel %vm925_vm10, %v920_v50, %v924_v1 }
 0x24c   : > { %v928_v14 = vadd.f32 %v926_v44, %v911_v41 }
 0x24e   : > { %933 = vst.msk [vmem:[#allocation3] sm:$0x3] %vm2181_vm7, %v928_v14 }
 0x24f   : > { %v965_v38 = vld [vmem:[#allocation2] sm:$0x3] }
 0x255   : > { %v963_v22 = vld [vmem:[#allocation3] sm:$0x3] }
 0x256   : > { %v964_v0 = vmax.f32 %v963_v22, 1.1754944e-38 }
 0x258   : > { %1428 = vlog2.f32 %v964_v0 }
 0x25e   : > { %v1429_v5 = vpop.eup %1428 }
 0x25f   : > { %v967_v11 = vmul.f32 0.6931472, %v1429_v5 }
 0x261   : > { %v968_v39 = vadd.f32 %v967_v11, %v965_v38 }
 0x263   : > { %969 = vst.msk [vmem:[%s2170_s13] sm:$0x3] %vm2181_vm7, %v968_v39 }
 0x264 PF: > { %s1244_s7 = sshll.u32 %s1544_s19, 1  ;;  %s997_s29 = sshll.u32 %s2170_s13, 4  ;;  %s998_s29 = int_to_ptr.vmem [resolvable:$true] %s997_s29 }
 0x265   : > { %s995_s24 = scalar_lea.hbm %s2271_s2, %s1244_s7  ;;  %s971_s8 = scalar_lea.sflag [#allocation6], %s1656_s6 }
 0x266   : > { %s999_s30 = sshll.u32 %s995_s24, 4  ;;  %s1450_s19 = scalar_lea.hbm %s2271_s2, 4  ;;  %s1000_s30 = int_to_ptr.hbm [resolvable:$true] %s999_s30 }
 0x267   : > { %s1444_s9 = sshra.s32 %s1000_s30, 4  ;;  %s1445_s9 = int_to_ptr.hbm [resolvable:$true] %s1444_s9 }
 0x268   : > { %s1446_s10 = scalar_lea.hbm %s1445_s9, 2  ;;  %p1451_p6 = scmp.lt.s32.totalorder %s1445_s9, %s2271_s2 }
 0x269   : > { %p1447_p2 = scmp.ne.s32.totalorder %s1445_s9, %s1446_s10  ;;  %p1452_p7 = scmp.lt.s32.totalorder %s1450_s19, %s1446_s10 }
 0x26b   : > { %p1448_p4 = pnand %p1447_p2, %p1635_p3  ;;  %p1453_p8 = por %p1452_p7, %p1451_p6 }
 0x26d   : > { %p1449_p5 = pneg %p1448_p4 }
 0x26f   : > { %p1454_p10 = pnand %p1453_p8, %p1449_p5 }
 0x271   : > { %1457 = shalt.err (!%p1454_p10)
}
 0x272   : > { %1281 = dma.vmem_to_hbm [thread:$0]  (%p1635_p3), %s998_s29, 32, %s1000_s30, %s971_s8  }
 0x273   : > { %s1009_s18 = scalar_lea.hbm %s2272_s3, %s1244_s7  ;;  %s1011_s24 = sshll.u32 %s2174_s14, 4  ;;  %s1012_s24 = int_to_ptr.vmem [resolvable:$true] %s1011_s24 }
 0x274   : > { %s1013_s11 = sshll.u32 %s1009_s18, 4  ;;  %s976_s0 = scalar_lea.sflag [#allocation8], %s1656_s6  ;;  %s1014_s11 = int_to_ptr.hbm [resolvable:$true] %s1013_s11 }
 0x275   : > { %s1472_s1 = sshra.s32 %s1014_s11, 4  ;;  %s1478_s29 = scalar_lea.hbm %s2272_s3, 4  ;;  %s1473_s1 = int_to_ptr.hbm [resolvable:$true] %s1472_s1 }
 0x276   : > { %s1474_s9 = scalar_lea.hbm %s1473_s1, 2  ;;  %p1479_p0 = scmp.lt.s32.totalorder %s1473_s1, %s2272_s3 }
 0x277   : > { %p1475_p11 = scmp.ne.s32.totalorder %s1473_s1, %s1474_s9  ;;  %p1480_p1 = scmp.lt.s32.totalorder %s1478_s29, %s1474_s9 }
 0x279   : > { %p1476_p12 = pnand %p1475_p11, %p1635_p3  ;;  %p1481_p2 = por %p1480_p1, %p1479_p0 }
 0x27b   : > { %p1477_p13 = pneg %p1476_p12 }
 0x27d   : > { %p1482_p4 = pnand %p1481_p2, %p1477_p13 }
 0x27f   : > { %1485 = shalt.err (!%p1482_p4)
}
 0x280   : > { %1282 = dma.vmem_to_hbm [thread:$0]  (%p1635_p3), %s1012_s24, 32, %s1014_s11, %s976_s0  }
 0x281 PF: > { %p1292_p5 = scmp.ge.s32.totalorder %s1556_s22, 2  ;;  %s1029_s6 = sand.u32 1, %s1528_s15  }
 0x282   : > { %s1030_s14 = scalar_lea.sflag [#allocation6], %s1029_s6 }
 0x283   : > { %p1286_p6 = pnand %p1292_p5, %p1645_p9 }
 0x285   : > { %p1287_p7 = pneg %p1286_p6 }
 0x287   : > { %1519 = dma.done.wait (%p1287_p7), %s1030_s14, 32  }
 0x288   : > { %1521 = vsyncadd (%p1287_p7), %s1030_s14, 4294967264  ;;  %s1040_s7 = scalar_lea.sflag [#allocation8], %s1029_s6 }
 0x289   : > { %1523 = dma.done.wait (%p1287_p7), %s1040_s7, 32  }
 0x28a   : > { %1525 = vsyncadd (%p1287_p7), %s1040_s7, 4294967264  ;;  %s21_s22 = sadd.s32 1, %s1556_s22   ;;  %s2282_s15 = smov %s1532_s16 }
 0x28b   : > { %p18_p8 = scmp.ge.s32.totalorder %s21_s22, 10   ;;  %s2283_s16 = smov %s1536_s17 }
 0x28c   : > { %s2284_s17 = smov %s1653_s5  ;;  %s2285_s18 = smov %s1548_s20 }
 0x28d   : > { %s2286_s19 = smov %s1552_s21  ;;  %s2287_s20 = smov %s2290_s25 }
 0x28e   : > { %s2288_s21 = smov %s2294_s26  ;;  %20 = sbr.rel (!%p18_p8) target bundleno = 10 (0xa), region = 103 }
 0x293   :  { %1058 = vsyncpa [#allocation6], 1 }
 0x294   :  { %1060 = vsyncpa [#allocation6 + $0x1], 1 }
 0x295   :  { %1061 = vsyncpa [#allocation8], 1 }
 0x296   :  { %1063 = vsyncpa [#allocation8 + $0x1], 1 }

</bundles_post_ra>
